<compile_context>
chip_gen: v7x
topology: tpu7x:2x2x1
jax: 0.10.0
libtpu: 0.0.40
codegen_flags: <defaults>
</compile_context>

<pallas_src>
import math

import jax
import jax.numpy as jnp
from jax import lax
from jax.experimental import pallas as pl
from jax.experimental.pallas import tpu as pltpu


def _round_up(x, m):
    return ((x + m - 1) // m) * m


def _cdiv(a, b):
    return (a + b - 1) // b


def _make_gru_kernel(BP, HP, BS, nsub, Tc, unroll):
    """Builds the chunked GRU kernel with static shape params baked in."""

    def gru_kernel(x_ref, wih_ref, whh_ref, bcomb_ref, bhn_ref, out_ref,
                   h_scr, gi_scr):
        # x_ref    : (Tc*BP, DP)     time-major input chunk (time x batch flattened)
        # wih_ref  : (DP, 3*HP) f32  input weights, gate-padded
        # whh_ref  : (HP, 3*HP) bf16 recurrent weights, gate-padded
        # bcomb_ref: (1, 3*HP)  f32  b_ih + (b_hr, b_hz, 0)
        # bhn_ref  : (1, HP)    f32  b_hn (must stay inside r * (.))
        # out_ref  : (Tc*BP, HP)     hidden states for the chunk (lane-dense)
        # h_scr    : (BP, HP)   f32  hidden state persisting across grid steps
        # gi_scr   : (Tc*BP, 3*HP) f32  per-chunk input-gate preactivations

        @pl.when(pl.program_id(0) == 0)
        def _():
            h_scr[...] = jnp.zeros_like(h_scr)

        # ---- Bulk input projection for the whole chunk: one MXU matmul, off the
        # serial critical path.  Foldable biases are already in bcomb.
        gi_scr[...] = (
            jnp.dot(x_ref[...], wih_ref[...], preferred_element_type=jnp.float32)
            + bcomb_ref[...]
        )

        # Hoisted once (JAX does not CSE broadcast_in_dim -> keep out of the loop).
        bhn = jnp.broadcast_to(bhn_ref[...], (BS, HP))

        # Hidden state per batch sub-tile lives in vregs for the whole loop.
        h0 = tuple(h_scr[pl.ds(s * BS, BS), :] for s in range(nsub))

        def step(t, hs):
            new_hs = []
            for s, h_prev in enumerate(hs):                 # independent chains
                row = pl.multiple_of(t * BP + s * BS, 8)
                # Recurrent matmul: bf16 operands, f32 accumulation; weight is
                # streamed from the ref (no big live value across the loop).
                gh = jnp.dot(h_prev.astype(jnp.bfloat16), whh_ref[...],
                             preferred_element_type=jnp.float32)      # (BS, 3*HP)
                gi_t = gi_scr[pl.ds(row, BS), :]                       # (BS, 3*HP)
                r = jax.nn.sigmoid(gi_t[:, 0:HP] + gh[:, 0:HP])
                z = jax.nn.sigmoid(gi_t[:, HP:2 * HP] + gh[:, HP:2 * HP])
                n = jnp.tanh(gi_t[:, 2 * HP:3 * HP]
                             + r * (gh[:, 2 * HP:3 * HP] + bhn))
                h_t = z * (h_prev - n) + n       # == (1-z)*n + z*h_prev
                out_ref[pl.ds(row, BS), :] = h_t.astype(out_ref.dtype)
                new_hs.append(h_t)
            return tuple(new_hs)

        hs_final = lax.fori_loop(0, Tc, step, h0, unroll=unroll)

        # Persist the hidden state once per chunk (not once per step).
        for s in range(nsub):
            h_scr[pl.ds(s * BS, BS), :] = hs_final[s]

    return gru_kernel


def _derive_time_chunk(T, BP, DP, HP, itemsize, budget_bytes):
    """Pick Tc/n_chunks so double-buffered blocks + gi scratch fit the VMEM budget
    and time padding wastes at most n_chunks-1 dead recurrence steps in total."""
    per_t = BP * (2 * DP * itemsize        # double-buffered x block
                  + 2 * HP * itemsize      # double-buffered out block
                  + 2 * 3 * HP * 4)        # gi scratch (+ headroom for the matmul)
    tc_max = max(1, min(budget_bytes // per_t, 1024))
    n_chunks = max(1, _cdiv(T, tc_max))
    tc = _cdiv(T, n_chunks)
    return tc, n_chunks


def nlp_encoder_forward(x, w_ih, w_hh, b_ih, b_hh,
                        *, vmem_block_budget=40 * 1024 * 1024):
    """GRU forward (num_layers=1, batch_first, h_0 = 0). x: (B, T, D) -> (B, T, H)."""
    B, T, D = x.shape
    H = w_hh.shape[1]

    HP = _round_up(H, 128)   # lane-dense per-gate width: 128-aligned gate slices
    DP = _round_up(D, 128)   # lane-dense input width (tile-aligned projection matmul)
    BP = _round_up(B, 8)     # sublane-aligned batch
    # NOTE: for tiny H (< ~43) the per-gate 128-lane padding wastes MXU columns;
    # acceptable here, revisit only if the production hidden size stays tiny.

    out_dtype = x.dtype
    itemsize = jnp.dtype(out_dtype).itemsize
    Tc, n_chunks = _derive_time_chunk(T, BP, DP, HP, itemsize, vmem_block_budget)
    Tp = Tc * n_chunks

    # Batch sub-tiles interleaved inside the step loop (independent dependence
    # chains hide per-step MXU->EUP->VPU latency). Degenerates to 1 at tiny B.
    nsub = 1
    for cand in (4, 2):
        if BP % (cand * 8) == 0:
            nsub = cand
            break
    BS = BP // nsub
    unroll = max(1, min(Tc, 8 // nsub))

    # ---- Host-side (XLA) prep: time-major, padded, flattened to 2-D so the kernel
    # never reshapes and every store is full-lane.
    x_tm = jnp.transpose(x, (1, 0, 2))                                  # (T, B, D)
    x_tm = jnp.pad(x_tm, ((0, Tp - T), (0, BP - B), (0, DP - D)))
    x_flat = x_tm.reshape(Tp * BP, DP)

    # Input weights (DP, 3*HP), f32 (the projection sits off the critical path).
    wih_p = jnp.pad(jnp.transpose(w_ih).reshape(D, 3, H),
                    ((0, DP - D), (0, 0), (0, HP - H))).reshape(DP, 3 * HP)
    wih_p = wih_p.astype(jnp.float32)

    # Recurrent weights (HP, 3*HP), bf16 for full MXU rate and half the footprint.
    whh_p = jnp.pad(jnp.transpose(w_hh).reshape(H, 3, H),
                    ((0, HP - H), (0, 0), (0, HP - H))).reshape(HP, 3 * HP)
    whh_p = whh_p.astype(jnp.bfloat16)

    # b_ih + (b_hr, b_hz, 0) folds into the projection; b_hn stays separate since
    # it must sit inside r * (.).
    b_comb = b_ih + jnp.concatenate(
        [b_hh[0:H], b_hh[H:2 * H], jnp.zeros((H,), b_hh.dtype)])
    bcomb_p = jnp.pad(b_comb.reshape(3, H),
                      ((0, 0), (0, HP - H))).reshape(1, 3 * HP).astype(jnp.float32)
    bhn_p = jnp.pad(b_hh[2 * H:3 * H].reshape(1, H),
                    ((0, 0), (0, HP - H))).astype(jnp.float32)

    kernel = _make_gru_kernel(BP, HP, BS, nsub, Tc, unroll)

    out_flat = pl.pallas_call(
        kernel,
        out_shape=jax.ShapeDtypeStruct((Tp * BP, HP), out_dtype),
        grid_spec=pltpu.PrefetchScalarGridSpec(
            num_scalar_prefetch=0,
            grid=(n_chunks,),
            in_specs=[
                pl.BlockSpec((Tc * BP, DP), lambda t: (t, 0)),   # streamed x chunk
                pl.BlockSpec((DP, 3 * HP), lambda t: (0, 0)),    # W_ih (resident)
                pl.BlockSpec((HP, 3 * HP), lambda t: (0, 0)),    # W_hh (resident)
                pl.BlockSpec((1, 3 * HP), lambda t: (0, 0)),     # folded biases
                pl.BlockSpec((1, HP), lambda t: (0, 0)),         # b_hn
            ],
            out_specs=pl.BlockSpec((Tc * BP, HP), lambda t: (t, 0)),
            scratch_shapes=[
                pltpu.VMEM((BP, HP), jnp.float32),            # h state across chunks
                pltpu.VMEM((Tc * BP, 3 * HP), jnp.float32),   # per-chunk gi
            ],
        ),
        compiler_params=pltpu.CompilerParams(
            # The time recurrence is serial.
            # TODO(synk): on v7x add a leading "parallel" batch-chunk grid axis
            # (per-chunk h_scr, init predicate on the time axis) to use both TCs.
            dimension_semantics=("arbitrary",),
            vmem_limit_bytes=48 * 1024 * 1024,
        ),
    )(x_flat, wih_p, whh_p, bcomb_p, bhn_p)

    out = out_flat.reshape(Tp, BP, HP)[:T, :B, :H]
    return jnp.transpose(out, (1, 0, 2))


def gru_reference(x, w_ih, w_hh, b_ih, b_hh):
    """Pure-JAX f32 reference (PyTorch GRU math) for the correctness check."""
    B, T, D = x.shape
    H = w_hh.shape[1]
    h0 = jnp.zeros((B, H), jnp.float32)

    def step(h_prev, x_t):
        gi = x_t @ w_ih.T + b_ih
        gh = h_prev @ w_hh.T + b_hh
        i_r, i_z, i_n = gi[:, :H], gi[:, H:2 * H], gi[:, 2 * H:]
        h_r, h_z, h_n = gh[:, :H], gh[:, H:2 * H], gh[:, 2 * H:]
        r = jax.nn.sigmoid(i_r + h_r)
        z = jax.nn.sigmoid(i_z + h_z)
        n = jnp.tanh(i_n + r * h_n)
        h_t = (1.0 - z) * n + z * h_prev
        return h_t, h_t

    _, ys = lax.scan(step, h0, jnp.transpose(x, (1, 0, 2)))
    return jnp.transpose(ys, (1, 0, 2))


if __name__ == "__main__":
    # Small shapes consistent with the module: batch=2, seq=8, input=16, hidden=32.
    B, T, INPUT, HIDDEN = 2, 8, 16, 32

    key = jax.random.PRNGKey(0)
    kx, k1, k2, k3, k4 = jax.random.split(key, 5)

    # Deterministic parameter init, matching PyTorch's U(-1/sqrt(H), 1/sqrt(H)).
    bound = 1.0 / math.sqrt(HIDDEN)
    w_ih = jax.random.uniform(k1, (3 * HIDDEN, INPUT), jnp.float32, -bound, bound)
    w_hh = jax.random.uniform(k2, (3 * HIDDEN, HIDDEN), jnp.float32, -bound, bound)
    b_ih = jax.random.uniform(k3, (3 * HIDDEN,), jnp.float32, -bound, bound)
    b_hh = jax.random.uniform(k4, (3 * HIDDEN,), jnp.float32, -bound, bound)

    x = jax.random.normal(kx, (B, T, INPUT), jnp.float32)

    out = jax.block_until_ready(nlp_encoder_forward(x, w_ih, w_hh, b_ih, b_hh))
    ref = jax.block_until_ready(gru_reference(x, w_ih, w_hh, b_ih, b_hh))

    assert out.shape == (B, T, HIDDEN), out.shape
    # bf16 recurrent-weight operands (f32 accumulation / carried state) -> slightly
    # looser tolerance than a pure-f32 kernel.
    assert jnp.allclose(out, ref, atol=2e-2, rtol=2e-2), "mismatch vs reference"

    print("KERNEL_OK")
</pallas_src>

<mosaic_0001>
module attributes {stable_mosaic.version = 11 : i64} {
  func.func @gru_kernel(%arg0: i32, %arg1: memref<64x128xf32, #tpu.memory_space<vmem>>, %arg2: memref<128x384xf32, #tpu.memory_space<vmem>>, %arg3: memref<128x384xbf16, #tpu.memory_space<vmem>>, %arg4: memref<1x384xf32, #tpu.memory_space<vmem>>, %arg5: memref<1x128xf32, #tpu.memory_space<vmem>>, %arg6: memref<64x128xf32, #tpu.memory_space<vmem>>, %arg7: memref<8x128xf32, #tpu.memory_space<vmem>>, %arg8: memref<64x384xf32, #tpu.memory_space<vmem>>) attributes {dimension_semantics = [#tpu.dimension_semantics<arbitrary>], iteration_bounds = array<i64: 1>, scalar_prefetch = 0 : i64, scratch_operands = 2 : i64, tpu.core_type = #tpu.core_type<tc>, window_params = [{transform_indices = @transform_0, window_bounds = array<i64: 64, 128>}, {pipeline_mode = #tpu.pipeline_mode<synchronous>, transform_indices = @transform_1, window_bounds = array<i64: 128, 384>}, {pipeline_mode = #tpu.pipeline_mode<synchronous>, transform_indices = @transform_2, window_bounds = array<i64: 128, 384>}, {pipeline_mode = #tpu.pipeline_mode<synchronous>, transform_indices = @transform_3, window_bounds = array<i64: 1, 384>}, {pipeline_mode = #tpu.pipeline_mode<synchronous>, transform_indices = @transform_4, window_bounds = array<i64: 1, 128>}, {transform_indices = @transform_5, window_bounds = array<i64: 64, 128>}]} {
    %c0_i32 = arith.constant 0 : i32
    %0 = arith.cmpi eq, %arg0, %c0_i32 : i32
    %1 = arith.extui %0 : i1 to i32
    %c0_i32_0 = arith.constant 0 : i32
    %2 = arith.cmpi ne, %1, %c0_i32_0 : i32
    scf.if %2 {
      %cst_87 = arith.constant 0.000000e+00 : f32
      %295 = vector.broadcast %cst_87 : f32 to vector<8x128xf32>
      %c0_88 = arith.constant 0 : index
      %c0_89 = arith.constant 0 : index
      %296 = vector.load %arg7[%c0_88, %c0_89] : memref<8x128xf32, #tpu.memory_space<vmem>>, vector<8x128xf32>
      tpu.vector_store %arg7[%c0_88, %c0_89], %295 {strides = array<i32>} : memref<8x128xf32, #tpu.memory_space<vmem>>, vector<8x128xf32>,
    } else {
    }
    %c0 = arith.constant 0 : index
    %c0_1 = arith.constant 0 : index
    %3 = vector.load %arg1[%c0, %c0_1] : memref<64x128xf32, #tpu.memory_space<vmem>>, vector<64x128xf32>
    %c0_2 = arith.constant 0 : index
    %c0_3 = arith.constant 0 : index
    %4 = vector.load %arg2[%c0_2, %c0_3] : memref<128x384xf32, #tpu.memory_space<vmem>>, vector<128x384xf32>
    %cst = arith.constant dense<0.000000e+00> : vector<64x384xf32>
    %5 = tpu.matmul %3, %4, %cst {dimension_numbers = #tpu.dot_dimension_numbers<[1], [0], [0], [1], [0, 0, 1, 1], [], []>} : vector<64x128xf32>, vector<128x384xf32>, vector<64x384xf32> -> vector<64x384xf32>
    %c0_4 = arith.constant 0 : index
    %c0_5 = arith.constant 0 : index
    %6 = vector.load %arg4[%c0_4, %c0_5] : memref<1x384xf32, #tpu.memory_space<vmem>>, vector<1x384xf32>
    %7 = vector.broadcast %6 : vector<1x384xf32> to vector<64x384xf32>
    %8 = arith.addf %5, %7 : vector<64x384xf32>
    %c0_6 = arith.constant 0 : index
    %c0_7 = arith.constant 0 : index
    %9 = vector.load %arg8[%c0_6, %c0_7] : memref<64x384xf32, #tpu.memory_space<vmem>>, vector<64x384xf32>
    tpu.vector_store %arg8[%c0_6, %c0_7], %8 {strides = array<i32>} : memref<64x384xf32, #tpu.memory_space<vmem>>, vector<64x384xf32>,
    %c0_8 = arith.constant 0 : index
    %c0_9 = arith.constant 0 : index
    %10 = vector.load %arg5[%c0_8, %c0_9] : memref<1x128xf32, #tpu.memory_space<vmem>>, vector<1x128xf32>
    %11 = vector.shape_cast %10 : vector<1x128xf32> to vector<1x128xf32>
    %12 = vector.broadcast %11 : vector<1x128xf32> to vector<8x128xf32>
    %c0_10 = arith.constant 0 : index
    %c0_11 = arith.constant 0 : index
    %13 = vector.load %arg7[%c0_10, %c0_11] : memref<8x128xf32, #tpu.memory_space<vmem>>, vector<8x128xf32>
    %c0_i32_12 = arith.constant 0 : i32
    %c8_i32 = arith.constant 8 : i32
    %14 = arith.muli %c0_i32_12, %c8_i32 : i32
    %c0_i32_13 = arith.constant 0 : i32
    %15 = arith.addi %14, %c0_i32_13 : i32
    %16 = tpu.assume_multiple %15, 8 : i32
    %17 = arith.truncf %13 : vector<8x128xf32> to vector<8x128xbf16>
    %c0_14 = arith.constant 0 : index
    %c0_15 = arith.constant 0 : index
    %18 = vector.load %arg3[%c0_14, %c0_15] : memref<128x384xbf16, #tpu.memory_space<vmem>>, vector<128x384xbf16>
    %cst_16 = arith.constant dense<0.000000e+00> : vector<8x384xf32>
    %19 = tpu.matmul %17, %18, %cst_16 {dimension_numbers = #tpu.dot_dimension_numbers<[1], [0], [0], [1], [0, 0, 1, 1], [], []>} : vector<8x128xbf16>, vector<128x384xbf16>, vector<8x384xf32> -> vector<8x384xf32>
    %20 = arith.index_cast %16 : i32 to index
    %c0_17 = arith.constant 0 : index
    %21 = vector.load %arg8[%20, %c0_17] : memref<64x384xf32, #tpu.memory_space<vmem>>, vector<8x384xf32>
    %22 = vector.extract_strided_slice %21 {offsets = [0, 0], sizes = [8, 128], strides = [1, 1]} : vector<8x384xf32> to vector<8x128xf32>
    %23 = vector.extract_strided_slice %19 {offsets = [0, 0], sizes = [8, 128], strides = [1, 1]} : vector<8x384xf32> to vector<8x128xf32>
    %24 = arith.addf %22, %23 : vector<8x128xf32>
    %25 = arith.negf %24 : vector<8x128xf32>
    %26 = math.exp %25 : vector<8x128xf32>
    %cst_18 = arith.constant 1.000000e+00 : f32
    %27 = vector.broadcast %cst_18 : f32 to vector<8x128xf32>
    %28 = arith.addf %27, %26 : vector<8x128xf32>
    %29 = arith.divf %27, %28 : vector<8x128xf32>
    %30 = vector.extract_strided_slice %21 {offsets = [0, 128], sizes = [8, 128], strides = [1, 1]} : vector<8x384xf32> to vector<8x128xf32>
    %31 = vector.extract_strided_slice %19 {offsets = [0, 128], sizes = [8, 128], strides = [1, 1]} : vector<8x384xf32> to vector<8x128xf32>
    %32 = arith.addf %30, %31 : vector<8x128xf32>
    %33 = arith.negf %32 : vector<8x128xf32>
    %34 = math.exp %33 : vector<8x128xf32>
    %cst_19 = arith.constant 1.000000e+00 : f32
    %35 = vector.broadcast %cst_19 : f32 to vector<8x128xf32>
    %36 = arith.addf %35, %34 : vector<8x128xf32>
    %37 = arith.divf %35, %36 : vector<8x128xf32>
    %38 = vector.extract_strided_slice %21 {offsets = [0, 256], sizes = [8, 128], strides = [1, 1]} : vector<8x384xf32> to vector<8x128xf32>
    %39 = vector.extract_strided_slice %19 {offsets = [0, 256], sizes = [8, 128], strides = [1, 1]} : vector<8x384xf32> to vector<8x128xf32>
    %40 = arith.addf %39, %12 : vector<8x128xf32>
    %41 = arith.mulf %29, %40 : vector<8x128xf32>
    %42 = arith.addf %38, %41 : vector<8x128xf32>
    %43 = math.tanh %42 : vector<8x128xf32>
    %44 = arith.subf %13, %43 : vector<8x128xf32>
    %45 = arith.mulf %37, %44 : vector<8x128xf32>
    %46 = arith.addf %45, %43 : vector<8x128xf32>
    %47 = arith.index_cast %16 : i32 to index
    %c0_20 = arith.constant 0 : index
    %48 = vector.load %arg6[%47, %c0_20] : memref<64x128xf32, #tpu.memory_space<vmem>>, vector<8x128xf32>
    tpu.vector_store %arg6[%47, %c0_20], %46 {strides = array<i32>} : memref<64x128xf32, #tpu.memory_space<vmem>>, vector<8x128xf32>,
    %c1_i32 = arith.constant 1 : i32
    %c8_i32_21 = arith.constant 8 : i32
    %49 = arith.muli %c1_i32, %c8_i32_21 : i32
    %c0_i32_22 = arith.constant 0 : i32
    %50 = arith.addi %49, %c0_i32_22 : i32
    %51 = tpu.assume_multiple %50, 8 : i32
    %52 = arith.truncf %46 : vector<8x128xf32> to vector<8x128xbf16>
    %c0_23 = arith.constant 0 : index
    %c0_24 = arith.constant 0 : index
    %53 = vector.load %arg3[%c0_23, %c0_24] : memref<128x384xbf16, #tpu.memory_space<vmem>>, vector<128x384xbf16>
    %cst_25 = arith.constant dense<0.000000e+00> : vector<8x384xf32>
    %54 = tpu.matmul %52, %53, %cst_25 {dimension_numbers = #tpu.dot_dimension_numbers<[1], [0], [0], [1], [0, 0, 1, 1], [], []>} : vector<8x128xbf16>, vector<128x384xbf16>, vector<8x384xf32> -> vector<8x384xf32>
    %55 = arith.index_cast %51 : i32 to index
    %c0_26 = arith.constant 0 : index
    %56 = vector.load %arg8[%55, %c0_26] : memref<64x384xf32, #tpu.memory_space<vmem>>, vector<8x384xf32>
    %57 = vector.extract_strided_slice %56 {offsets = [0, 0], sizes = [8, 128], strides = [1, 1]} : vector<8x384xf32> to vector<8x128xf32>
    %58 = vector.extract_strided_slice %54 {offsets = [0, 0], sizes = [8, 128], strides = [1, 1]} : vector<8x384xf32> to vector<8x128xf32>
    %59 = arith.addf %57, %58 : vector<8x128xf32>
    %60 = arith.negf %59 : vector<8x128xf32>
    %61 = math.exp %60 : vector<8x128xf32>
    %cst_27 = arith.constant 1.000000e+00 : f32
    %62 = vector.broadcast %cst_27 : f32 to vector<8x128xf32>
    %63 = arith.addf %62, %61 : vector<8x128xf32>
    %64 = arith.divf %62, %63 : vector<8x128xf32>
    %65 = vector.extract_strided_slice %56 {offsets = [0, 128], sizes = [8, 128], strides = [1, 1]} : vector<8x384xf32> to vector<8x128xf32>
    %66 = vector.extract_strided_slice %54 {offsets = [0, 128], sizes = [8, 128], strides = [1, 1]} : vector<8x384xf32> to vector<8x128xf32>
    %67 = arith.addf %65, %66 : vector<8x128xf32>
    %68 = arith.negf %67 : vector<8x128xf32>
    %69 = math.exp %68 : vector<8x128xf32>
    %cst_28 = arith.constant 1.000000e+00 : f32
    %70 = vector.broadcast %cst_28 : f32 to vector<8x128xf32>
    %71 = arith.addf %70, %69 : vector<8x128xf32>
    %72 = arith.divf %70, %71 : vector<8x128xf32>
    %73 = vector.extract_strided_slice %56 {offsets = [0, 256], sizes = [8, 128], strides = [1, 1]} : vector<8x384xf32> to vector<8x128xf32>
    %74 = vector.extract_strided_slice %54 {offsets = [0, 256], sizes = [8, 128], strides = [1, 1]} : vector<8x384xf32> to vector<8x128xf32>
    %75 = arith.addf %74, %12 : vector<8x128xf32>
    %76 = arith.mulf %64, %75 : vector<8x128xf32>
    %77 = arith.addf %73, %76 : vector<8x128xf32>
    %78 = math.tanh %77 : vector<8x128xf32>
    %79 = arith.subf %46, %78 : vector<8x128xf32>
    %80 = arith.mulf %72, %79 : vector<8x128xf32>
    %81 = arith.addf %80, %78 : vector<8x128xf32>
    %82 = arith.index_cast %51 : i32 to index
    %c0_29 = arith.constant 0 : index
    %83 = vector.load %arg6[%82, %c0_29] : memref<64x128xf32, #tpu.memory_space<vmem>>, vector<8x128xf32>
    tpu.vector_store %arg6[%82, %c0_29], %81 {strides = array<i32>} : memref<64x128xf32, #tpu.memory_space<vmem>>, vector<8x128xf32>,
    %c2_i32 = arith.constant 2 : i32
    %c8_i32_30 = arith.constant 8 : i32
    %84 = arith.muli %c2_i32, %c8_i32_30 : i32
    %c0_i32_31 = arith.constant 0 : i32
    %85 = arith.addi %84, %c0_i32_31 : i32
    %86 = tpu.assume_multiple %85, 8 : i32
    %87 = arith.truncf %81 : vector<8x128xf32> to vector<8x128xbf16>
    %c0_32 = arith.constant 0 : index
    %c0_33 = arith.constant 0 : index
    %88 = vector.load %arg3[%c0_32, %c0_33] : memref<128x384xbf16, #tpu.memory_space<vmem>>, vector<128x384xbf16>
    %cst_34 = arith.constant dense<0.000000e+00> : vector<8x384xf32>
    %89 = tpu.matmul %87, %88, %cst_34 {dimension_numbers = #tpu.dot_dimension_numbers<[1], [0], [0], [1], [0, 0, 1, 1], [], []>} : vector<8x128xbf16>, vector<128x384xbf16>, vector<8x384xf32> -> vector<8x384xf32>
    %90 = arith.index_cast %86 : i32 to index
    %c0_35 = arith.constant 0 : index
    %91 = vector.load %arg8[%90, %c0_35] : memref<64x384xf32, #tpu.memory_space<vmem>>, vector<8x384xf32>
    %92 = vector.extract_strided_slice %91 {offsets = [0, 0], sizes = [8, 128], strides = [1, 1]} : vector<8x384xf32> to vector<8x128xf32>
    %93 = vector.extract_strided_slice %89 {offsets = [0, 0], sizes = [8, 128], strides = [1, 1]} : vector<8x384xf32> to vector<8x128xf32>
    %94 = arith.addf %92, %93 : vector<8x128xf32>
    %95 = arith.negf %94 : vector<8x128xf32>
    %96 = math.exp %95 : vector<8x128xf32>
    %cst_36 = arith.constant 1.000000e+00 : f32
    %97 = vector.broadcast %cst_36 : f32 to vector<8x128xf32>
    %98 = arith.addf %97, %96 : vector<8x128xf32>
    %99 = arith.divf %97, %98 : vector<8x128xf32>
    %100 = vector.extract_strided_slice %91 {offsets = [0, 128], sizes = [8, 128], strides = [1, 1]} : vector<8x384xf32> to vector<8x128xf32>
    %101 = vector.extract_strided_slice %89 {offsets = [0, 128], sizes = [8, 128], strides = [1, 1]} : vector<8x384xf32> to vector<8x128xf32>
    %102 = arith.addf %100, %101 : vector<8x128xf32>
    %103 = arith.negf %102 : vector<8x128xf32>
    %104 = math.exp %103 : vector<8x128xf32>
    %cst_37 = arith.constant 1.000000e+00 : f32
    %105 = vector.broadcast %cst_37 : f32 to vector<8x128xf32>
    %106 = arith.addf %105, %104 : vector<8x128xf32>
    %107 = arith.divf %105, %106 : vector<8x128xf32>
    %108 = vector.extract_strided_slice %91 {offsets = [0, 256], sizes = [8, 128], strides = [1, 1]} : vector<8x384xf32> to vector<8x128xf32>
    %109 = vector.extract_strided_slice %89 {offsets = [0, 256], sizes = [8, 128], strides = [1, 1]} : vector<8x384xf32> to vector<8x128xf32>
    %110 = arith.addf %109, %12 : vector<8x128xf32>
    %111 = arith.mulf %99, %110 : vector<8x128xf32>
    %112 = arith.addf %108, %111 : vector<8x128xf32>
    %113 = math.tanh %112 : vector<8x128xf32>
    %114 = arith.subf %81, %113 : vector<8x128xf32>
    %115 = arith.mulf %107, %114 : vector<8x128xf32>
    %116 = arith.addf %115, %113 : vector<8x128xf32>
    %117 = arith.index_cast %86 : i32 to index
    %c0_38 = arith.constant 0 : index
    %118 = vector.load %arg6[%117, %c0_38] : memref<64x128xf32, #tpu.memory_space<vmem>>, vector<8x128xf32>
    tpu.vector_store %arg6[%117, %c0_38], %116 {strides = array<i32>} : memref<64x128xf32, #tpu.memory_space<vmem>>, vector<8x128xf32>,
    %c3_i32 = arith.constant 3 : i32
    %c8_i32_39 = arith.constant 8 : i32
    %119 = arith.muli %c3_i32, %c8_i32_39 : i32
    %c0_i32_40 = arith.constant 0 : i32
    %120 = arith.addi %119, %c0_i32_40 : i32
    %121 = tpu.assume_multiple %120, 8 : i32
    %122 = arith.truncf %116 : vector<8x128xf32> to vector<8x128xbf16>
    %c0_41 = arith.constant 0 : index
    %c0_42 = arith.constant 0 : index
    %123 = vector.load %arg3[%c0_41, %c0_42] : memref<128x384xbf16, #tpu.memory_space<vmem>>, vector<128x384xbf16>
    %cst_43 = arith.constant dense<0.000000e+00> : vector<8x384xf32>
    %124 = tpu.matmul %122, %123, %cst_43 {dimension_numbers = #tpu.dot_dimension_numbers<[1], [0], [0], [1], [0, 0, 1, 1], [], []>} : vector<8x128xbf16>, vector<128x384xbf16>, vector<8x384xf32> -> vector<8x384xf32>
    %125 = arith.index_cast %121 : i32 to index
    %c0_44 = arith.constant 0 : index
    %126 = vector.load %arg8[%125, %c0_44] : memref<64x384xf32, #tpu.memory_space<vmem>>, vector<8x384xf32>
    %127 = vector.extract_strided_slice %126 {offsets = [0, 0], sizes = [8, 128], strides = [1, 1]} : vector<8x384xf32> to vector<8x128xf32>
    %128 = vector.extract_strided_slice %124 {offsets = [0, 0], sizes = [8, 128], strides = [1, 1]} : vector<8x384xf32> to vector<8x128xf32>
    %129 = arith.addf %127, %128 : vector<8x128xf32>
    %130 = arith.negf %129 : vector<8x128xf32>
    %131 = math.exp %130 : vector<8x128xf32>
    %cst_45 = arith.constant 1.000000e+00 : f32
    %132 = vector.broadcast %cst_45 : f32 to vector<8x128xf32>
    %133 = arith.addf %132, %131 : vector<8x128xf32>
    %134 = arith.divf %132, %133 : vector<8x128xf32>
    %135 = vector.extract_strided_slice %126 {offsets = [0, 128], sizes = [8, 128], strides = [1, 1]} : vector<8x384xf32> to vector<8x128xf32>
    %136 = vector.extract_strided_slice %124 {offsets = [0, 128], sizes = [8, 128], strides = [1, 1]} : vector<8x384xf32> to vector<8x128xf32>
    %137 = arith.addf %135, %136 : vector<8x128xf32>
    %138 = arith.negf %137 : vector<8x128xf32>
    %139 = math.exp %138 : vector<8x128xf32>
    %cst_46 = arith.constant 1.000000e+00 : f32
    %140 = vector.broadcast %cst_46 : f32 to vector<8x128xf32>
    %141 = arith.addf %140, %139 : vector<8x128xf32>
    %142 = arith.divf %140, %141 : vector<8x128xf32>
    %143 = vector.extract_strided_slice %126 {offsets = [0, 256], sizes = [8, 128], strides = [1, 1]} : vector<8x384xf32> to vector<8x128xf32>
    %144 = vector.extract_strided_slice %124 {offsets = [0, 256], sizes = [8, 128], strides = [1, 1]} : vector<8x384xf32> to vector<8x128xf32>
    %145 = arith.addf %144, %12 : vector<8x128xf32>
    %146 = arith.mulf %134, %145 : vector<8x128xf32>
    %147 = arith.addf %143, %146 : vector<8x128xf32>
    %148 = math.tanh %147 : vector<8x128xf32>
    %149 = arith.subf %116, %148 : vector<8x128xf32>
    %150 = arith.mulf %142, %149 : vector<8x128xf32>
    %151 = arith.addf %150, %148 : vector<8x128xf32>
    %152 = arith.index_cast %121 : i32 to index
    %c0_47 = arith.constant 0 : index
    %153 = vector.load %arg6[%152, %c0_47] : memref<64x128xf32, #tpu.memory_space<vmem>>, vector<8x128xf32>
    tpu.vector_store %arg6[%152, %c0_47], %151 {strides = array<i32>} : memref<64x128xf32, #tpu.memory_space<vmem>>, vector<8x128xf32>,
    %c4_i32 = arith.constant 4 : i32
    %c8_i32_48 = arith.constant 8 : i32
    %154 = arith.muli %c4_i32, %c8_i32_48 : i32
    %c0_i32_49 = arith.constant 0 : i32
    %155 = arith.addi %154, %c0_i32_49 : i32
    %156 = tpu.assume_multiple %155, 8 : i32
    %157 = arith.truncf %151 : vector<8x128xf32> to vector<8x128xbf16>
    %c0_50 = arith.constant 0 : index
    %c0_51 = arith.constant 0 : index
    %158 = vector.load %arg3[%c0_50, %c0_51] : memref<128x384xbf16, #tpu.memory_space<vmem>>, vector<128x384xbf16>
    %cst_52 = arith.constant dense<0.000000e+00> : vector<8x384xf32>
    %159 = tpu.matmul %157, %158, %cst_52 {dimension_numbers = #tpu.dot_dimension_numbers<[1], [0], [0], [1], [0, 0, 1, 1], [], []>} : vector<8x128xbf16>, vector<128x384xbf16>, vector<8x384xf32> -> vector<8x384xf32>
    %160 = arith.index_cast %156 : i32 to index
    %c0_53 = arith.constant 0 : index
    %161 = vector.load %arg8[%160, %c0_53] : memref<64x384xf32, #tpu.memory_space<vmem>>, vector<8x384xf32>
    %162 = vector.extract_strided_slice %161 {offsets = [0, 0], sizes = [8, 128], strides = [1, 1]} : vector<8x384xf32> to vector<8x128xf32>
    %163 = vector.extract_strided_slice %159 {offsets = [0, 0], sizes = [8, 128], strides = [1, 1]} : vector<8x384xf32> to vector<8x128xf32>
    %164 = arith.addf %162, %163 : vector<8x128xf32>
    %165 = arith.negf %164 : vector<8x128xf32>
    %166 = math.exp %165 : vector<8x128xf32>
    %cst_54 = arith.constant 1.000000e+00 : f32
    %167 = vector.broadcast %cst_54 : f32 to vector<8x128xf32>
    %168 = arith.addf %167, %166 : vector<8x128xf32>
    %169 = arith.divf %167, %168 : vector<8x128xf32>
    %170 = vector.extract_strided_slice %161 {offsets = [0, 128], sizes = [8, 128], strides = [1, 1]} : vector<8x384xf32> to vector<8x128xf32>
    %171 = vector.extract_strided_slice %159 {offsets = [0, 128], sizes = [8, 128], strides = [1, 1]} : vector<8x384xf32> to vector<8x128xf32>
    %172 = arith.addf %170, %171 : vector<8x128xf32>
    %173 = arith.negf %172 : vector<8x128xf32>
    %174 = math.exp %173 : vector<8x128xf32>
    %cst_55 = arith.constant 1.000000e+00 : f32
    %175 = vector.broadcast %cst_55 : f32 to vector<8x128xf32>
    %176 = arith.addf %175, %174 : vector<8x128xf32>
    %177 = arith.divf %175, %176 : vector<8x128xf32>
    %178 = vector.extract_strided_slice %161 {offsets = [0, 256], sizes = [8, 128], strides = [1, 1]} : vector<8x384xf32> to vector<8x128xf32>
    %179 = vector.extract_strided_slice %159 {offsets = [0, 256], sizes = [8, 128], strides = [1, 1]} : vector<8x384xf32> to vector<8x128xf32>
    %180 = arith.addf %179, %12 : vector<8x128xf32>
    %181 = arith.mulf %169, %180 : vector<8x128xf32>
    %182 = arith.addf %178, %181 : vector<8x128xf32>
    %183 = math.tanh %182 : vector<8x128xf32>
    %184 = arith.subf %151, %183 : vector<8x128xf32>
    %185 = arith.mulf %177, %184 : vector<8x128xf32>
    %186 = arith.addf %185, %183 : vector<8x128xf32>
    %187 = arith.index_cast %156 : i32 to index
    %c0_56 = arith.constant 0 : index
    %188 = vector.load %arg6[%187, %c0_56] : memref<64x128xf32, #tpu.memory_space<vmem>>, vector<8x128xf32>
    tpu.vector_store %arg6[%187, %c0_56], %186 {strides = array<i32>} : memref<64x128xf32, #tpu.memory_space<vmem>>, vector<8x128xf32>,
    %c5_i32 = arith.constant 5 : i32
    %c8_i32_57 = arith.constant 8 : i32
    %189 = arith.muli %c5_i32, %c8_i32_57 : i32
    %c0_i32_58 = arith.constant 0 : i32
    %190 = arith.addi %189, %c0_i32_58 : i32
    %191 = tpu.assume_multiple %190, 8 : i32
    %192 = arith.truncf %186 : vector<8x128xf32> to vector<8x128xbf16>
    %c0_59 = arith.constant 0 : index
    %c0_60 = arith.constant 0 : index
    %193 = vector.load %arg3[%c0_59, %c0_60] : memref<128x384xbf16, #tpu.memory_space<vmem>>, vector<128x384xbf16>
    %cst_61 = arith.constant dense<0.000000e+00> : vector<8x384xf32>
    %194 = tpu.matmul %192, %193, %cst_61 {dimension_numbers = #tpu.dot_dimension_numbers<[1], [0], [0], [1], [0, 0, 1, 1], [], []>} : vector<8x128xbf16>, vector<128x384xbf16>, vector<8x384xf32> -> vector<8x384xf32>
    %195 = arith.index_cast %191 : i32 to index
    %c0_62 = arith.constant 0 : index
    %196 = vector.load %arg8[%195, %c0_62] : memref<64x384xf32, #tpu.memory_space<vmem>>, vector<8x384xf32>
    %197 = vector.extract_strided_slice %196 {offsets = [0, 0], sizes = [8, 128], strides = [1, 1]} : vector<8x384xf32> to vector<8x128xf32>
    %198 = vector.extract_strided_slice %194 {offsets = [0, 0], sizes = [8, 128], strides = [1, 1]} : vector<8x384xf32> to vector<8x128xf32>
    %199 = arith.addf %197, %198 : vector<8x128xf32>
    %200 = arith.negf %199 : vector<8x128xf32>
    %201 = math.exp %200 : vector<8x128xf32>
    %cst_63 = arith.constant 1.000000e+00 : f32
    %202 = vector.broadcast %cst_63 : f32 to vector<8x128xf32>
    %203 = arith.addf %202, %201 : vector<8x128xf32>
    %204 = arith.divf %202, %203 : vector<8x128xf32>
    %205 = vector.extract_strided_slice %196 {offsets = [0, 128], sizes = [8, 128], strides = [1, 1]} : vector<8x384xf32> to vector<8x128xf32>
    %206 = vector.extract_strided_slice %194 {offsets = [0, 128], sizes = [8, 128], strides = [1, 1]} : vector<8x384xf32> to vector<8x128xf32>
    %207 = arith.addf %205, %206 : vector<8x128xf32>
    %208 = arith.negf %207 : vector<8x128xf32>
    %209 = math.exp %208 : vector<8x128xf32>
    %cst_64 = arith.constant 1.000000e+00 : f32
    %210 = vector.broadcast %cst_64 : f32 to vector<8x128xf32>
    %211 = arith.addf %210, %209 : vector<8x128xf32>
    %212 = arith.divf %210, %211 : vector<8x128xf32>
    %213 = vector.extract_strided_slice %196 {offsets = [0, 256], sizes = [8, 128], strides = [1, 1]} : vector<8x384xf32> to vector<8x128xf32>
    %214 = vector.extract_strided_slice %194 {offsets = [0, 256], sizes = [8, 128], strides = [1, 1]} : vector<8x384xf32> to vector<8x128xf32>
    %215 = arith.addf %214, %12 : vector<8x128xf32>
    %216 = arith.mulf %204, %215 : vector<8x128xf32>
    %217 = arith.addf %213, %216 : vector<8x128xf32>
    %218 = math.tanh %217 : vector<8x128xf32>
    %219 = arith.subf %186, %218 : vector<8x128xf32>
    %220 = arith.mulf %212, %219 : vector<8x128xf32>
    %221 = arith.addf %220, %218 : vector<8x128xf32>
    %222 = arith.index_cast %191 : i32 to index
    %c0_65 = arith.constant 0 : index
    %223 = vector.load %arg6[%222, %c0_65] : memref<64x128xf32, #tpu.memory_space<vmem>>, vector<8x128xf32>
    tpu.vector_store %arg6[%222, %c0_65], %221 {strides = array<i32>} : memref<64x128xf32, #tpu.memory_space<vmem>>, vector<8x128xf32>,
    %c6_i32 = arith.constant 6 : i32
    %c8_i32_66 = arith.constant 8 : i32
    %224 = arith.muli %c6_i32, %c8_i32_66 : i32
    %c0_i32_67 = arith.constant 0 : i32
    %225 = arith.addi %224, %c0_i32_67 : i32
    %226 = tpu.assume_multiple %225, 8 : i32
    %227 = arith.truncf %221 : vector<8x128xf32> to vector<8x128xbf16>
    %c0_68 = arith.constant 0 : index
    %c0_69 = arith.constant 0 : index
    %228 = vector.load %arg3[%c0_68, %c0_69] : memref<128x384xbf16, #tpu.memory_space<vmem>>, vector<128x384xbf16>
    %cst_70 = arith.constant dense<0.000000e+00> : vector<8x384xf32>
    %229 = tpu.matmul %227, %228, %cst_70 {dimension_numbers = #tpu.dot_dimension_numbers<[1], [0], [0], [1], [0, 0, 1, 1], [], []>} : vector<8x128xbf16>, vector<128x384xbf16>, vector<8x384xf32> -> vector<8x384xf32>
    %230 = arith.index_cast %226 : i32 to index
    %c0_71 = arith.constant 0 : index
    %231 = vector.load %arg8[%230, %c0_71] : memref<64x384xf32, #tpu.memory_space<vmem>>, vector<8x384xf32>
    %232 = vector.extract_strided_slice %231 {offsets = [0, 0], sizes = [8, 128], strides = [1, 1]} : vector<8x384xf32> to vector<8x128xf32>
    %233 = vector.extract_strided_slice %229 {offsets = [0, 0], sizes = [8, 128], strides = [1, 1]} : vector<8x384xf32> to vector<8x128xf32>
    %234 = arith.addf %232, %233 : vector<8x128xf32>
    %235 = arith.negf %234 : vector<8x128xf32>
    %236 = math.exp %235 : vector<8x128xf32>
    %cst_72 = arith.constant 1.000000e+00 : f32
    %237 = vector.broadcast %cst_72 : f32 to vector<8x128xf32>
    %238 = arith.addf %237, %236 : vector<8x128xf32>
    %239 = arith.divf %237, %238 : vector<8x128xf32>
    %240 = vector.extract_strided_slice %231 {offsets = [0, 128], sizes = [8, 128], strides = [1, 1]} : vector<8x384xf32> to vector<8x128xf32>
    %241 = vector.extract_strided_slice %229 {offsets = [0, 128], sizes = [8, 128], strides = [1, 1]} : vector<8x384xf32> to vector<8x128xf32>
    %242 = arith.addf %240, %241 : vector<8x128xf32>
    %243 = arith.negf %242 : vector<8x128xf32>
    %244 = math.exp %243 : vector<8x128xf32>
    %cst_73 = arith.constant 1.000000e+00 : f32
    %245 = vector.broadcast %cst_73 : f32 to vector<8x128xf32>
    %246 = arith.addf %245, %244 : vector<8x128xf32>
    %247 = arith.divf %245, %246 : vector<8x128xf32>
    %248 = vector.extract_strided_slice %231 {offsets = [0, 256], sizes = [8, 128], strides = [1, 1]} : vector<8x384xf32> to vector<8x128xf32>
    %249 = vector.extract_strided_slice %229 {offsets = [0, 256], sizes = [8, 128], strides = [1, 1]} : vector<8x384xf32> to vector<8x128xf32>
    %250 = arith.addf %249, %12 : vector<8x128xf32>
    %251 = arith.mulf %239, %250 : vector<8x128xf32>
    %252 = arith.addf %248, %251 : vector<8x128xf32>
    %253 = math.tanh %252 : vector<8x128xf32>
    %254 = arith.subf %221, %253 : vector<8x128xf32>
    %255 = arith.mulf %247, %254 : vector<8x128xf32>
    %256 = arith.addf %255, %253 : vector<8x128xf32>
    %257 = arith.index_cast %226 : i32 to index
    %c0_74 = arith.constant 0 : index
    %258 = vector.load %arg6[%257, %c0_74] : memref<64x128xf32, #tpu.memory_space<vmem>>, vector<8x128xf32>
    tpu.vector_store %arg6[%257, %c0_74], %256 {strides = array<i32>} : memref<64x128xf32, #tpu.memory_space<vmem>>, vector<8x128xf32>,
    %c7_i32 = arith.constant 7 : i32
    %c8_i32_75 = arith.constant 8 : i32
    %259 = arith.muli %c7_i32, %c8_i32_75 : i32
    %c0_i32_76 = arith.constant 0 : i32
    %260 = arith.addi %259, %c0_i32_76 : i32
    %261 = tpu.assume_multiple %260, 8 : i32
    %262 = arith.truncf %256 : vector<8x128xf32> to vector<8x128xbf16>
    %c0_77 = arith.constant 0 : index
    %c0_78 = arith.constant 0 : index
    %263 = vector.load %arg3[%c0_77, %c0_78] : memref<128x384xbf16, #tpu.memory_space<vmem>>, vector<128x384xbf16>
    %cst_79 = arith.constant dense<0.000000e+00> : vector<8x384xf32>
    %264 = tpu.matmul %262, %263, %cst_79 {dimension_numbers = #tpu.dot_dimension_numbers<[1], [0], [0], [1], [0, 0, 1, 1], [], []>} : vector<8x128xbf16>, vector<128x384xbf16>, vector<8x384xf32> -> vector<8x384xf32>
    %265 = arith.index_cast %261 : i32 to index
    %c0_80 = arith.constant 0 : index
    %266 = vector.load %arg8[%265, %c0_80] : memref<64x384xf32, #tpu.memory_space<vmem>>, vector<8x384xf32>
    %267 = vector.extract_strided_slice %266 {offsets = [0, 0], sizes = [8, 128], strides = [1, 1]} : vector<8x384xf32> to vector<8x128xf32>
    %268 = vector.extract_strided_slice %264 {offsets = [0, 0], sizes = [8, 128], strides = [1, 1]} : vector<8x384xf32> to vector<8x128xf32>
    %269 = arith.addf %267, %268 : vector<8x128xf32>
    %270 = arith.negf %269 : vector<8x128xf32>
    %271 = math.exp %270 : vector<8x128xf32>
    %cst_81 = arith.constant 1.000000e+00 : f32
    %272 = vector.broadcast %cst_81 : f32 to vector<8x128xf32>
    %273 = arith.addf %272, %271 : vector<8x128xf32>
    %274 = arith.divf %272, %273 : vector<8x128xf32>
    %275 = vector.extract_strided_slice %266 {offsets = [0, 128], sizes = [8, 128], strides = [1, 1]} : vector<8x384xf32> to vector<8x128xf32>
    %276 = vector.extract_strided_slice %264 {offsets = [0, 128], sizes = [8, 128], strides = [1, 1]} : vector<8x384xf32> to vector<8x128xf32>
    %277 = arith.addf %275, %276 : vector<8x128xf32>
    %278 = arith.negf %277 : vector<8x128xf32>
    %279 = math.exp %278 : vector<8x128xf32>
    %cst_82 = arith.constant 1.000000e+00 : f32
    %280 = vector.broadcast %cst_82 : f32 to vector<8x128xf32>
    %281 = arith.addf %280, %279 : vector<8x128xf32>
    %282 = arith.divf %280, %281 : vector<8x128xf32>
    %283 = vector.extract_strided_slice %266 {offsets = [0, 256], sizes = [8, 128], strides = [1, 1]} : vector<8x384xf32> to vector<8x128xf32>
    %284 = vector.extract_strided_slice %264 {offsets = [0, 256], sizes = [8, 128], strides = [1, 1]} : vector<8x384xf32> to vector<8x128xf32>
    %285 = arith.addf %284, %12 : vector<8x128xf32>
    %286 = arith.mulf %274, %285 : vector<8x128xf32>
    %287 = arith.addf %283, %286 : vector<8x128xf32>
    %288 = math.tanh %287 : vector<8x128xf32>
    %289 = arith.subf %256, %288 : vector<8x128xf32>
    %290 = arith.mulf %282, %289 : vector<8x128xf32>
    %291 = arith.addf %290, %288 : vector<8x128xf32>
    %292 = arith.index_cast %261 : i32 to index
    %c0_83 = arith.constant 0 : index
    %293 = vector.load %arg6[%292, %c0_83] : memref<64x128xf32, #tpu.memory_space<vmem>>, vector<8x128xf32>
    tpu.vector_store %arg6[%292, %c0_83], %291 {strides = array<i32>} : memref<64x128xf32, #tpu.memory_space<vmem>>, vector<8x128xf32>,
    %c8_i32_84 = arith.constant 8 : i32
    %c0_85 = arith.constant 0 : index
    %c0_86 = arith.constant 0 : index
    %294 = vector.load %arg7[%c0_85, %c0_86] : memref<8x128xf32, #tpu.memory_space<vmem>>, vector<8x128xf32>
    tpu.vector_store %arg7[%c0_85, %c0_86], %291 {strides = array<i32>} : memref<8x128xf32, #tpu.memory_space<vmem>>, vector<8x128xf32>,
    return
  }
  func.func @transform_0(%arg0: i32) -> (i32, i32) {
    %c0_i32 = arith.constant 0 : i32
    %c0_i32_0 = arith.constant 0 : i32
    return %arg0, %c0_i32 : i32, i32
  }
  func.func @transform_1(%arg0: i32) -> (i32, i32) {
    %c0_i32 = arith.constant 0 : i32
    %c0_i32_0 = arith.constant 0 : i32
    %c0_i32_1 = arith.constant 0 : i32
    return %c0_i32, %c0_i32_0 : i32, i32
  }
  func.func @transform_2(%arg0: i32) -> (i32, i32) {
    %c0_i32 = arith.constant 0 : i32
    %c0_i32_0 = arith.constant 0 : i32
    %c0_i32_1 = arith.constant 0 : i32
    return %c0_i32, %c0_i32_0 : i32, i32
  }
  func.func @transform_3(%arg0: i32) -> (i32, i32) {
    %c0_i32 = arith.constant 0 : i32
    %c0_i32_0 = arith.constant 0 : i32
    %c0_i32_1 = arith.constant 0 : i32
    return %c0_i32, %c0_i32_0 : i32, i32
  }
  func.func @transform_4(%arg0: i32) -> (i32, i32) {
    %c0_i32 = arith.constant 0 : i32
    %c0_i32_0 = arith.constant 0 : i32
    %c0_i32_1 = arith.constant 0 : i32
    return %c0_i32, %c0_i32_0 : i32, i32
  }
  func.func @transform_5(%arg0: i32) -> (i32, i32) {
    %c0_i32 = arith.constant 0 : i32
    %c0_i32_0 = arith.constant 0 : i32
    return %arg0, %c0_i32 : i32, i32
  }
}

</mosaic_0001>

<bundles_post_ra>
// kernel: tpu_custom_call.1
= control target key start
LH: loop header
LB: loop body
LE: loop exit
PB: predicated region body
PF: predicated region fallthrough
CT: control target
= control target key end

     0   :  { %10 = vsyncpa [#allocation5], 0  ;;  %s3968_s0 = inlined_call_operand.hbm [shape: f32[64,128], index: 0, kind: input, shape index: {}]   ;;  %s3969_s1 = inlined_call_operand.hbm [shape: f32[128,384], index: 1, kind: input, shape index: {}]   ;;  %s3970_s2 = inlined_call_operand.hbm [shape: bf16[128,384], index: 2, kind: input, shape index: {}]   ;;  %s3971_s3 = inlined_call_operand.vmem [shape: f32[1,384], index: 3, kind: input, shape index: {}]   ;;  %s3972_s4 = inlined_call_operand.vmem [shape: f32[1,128], index: 4, kind: input, shape index: {}]   ;;  %s3973_s5 = inlined_call_operand.hbm [shape: f32[64,128], index: 5, kind: output, shape index: {}]  }
   0x1   :  { %11 = vsyncpa [#allocation8], 0 }
   0x2   :  { %12 = vsyncpa [#allocation6], 0  ;;  %s3457_s18 = smov [#allocation7]   ;;  %s3363_s22 = scalar_lea.hbm %s3969_s1, 6144 }
   0x3   :  { %s30_s19 = sshll.u32 %s3457_s18, 4  ;;  %p3364_p0 = scmp.ne.s32.totalorder %s3969_s1, %s3363_s22  ;;  %s31_s19 = int_to_ptr.vmem [resolvable:$true] %s30_s19 }
   0x4   :  { %p3367_p1 = scmp.lt.u32.totalorder %s3363_s22, %s3969_s1 }
   0x6   :  { %p3369_p2 = pnand %p3367_p1, %p3364_p0 }
   0x8   :  { %3372 = shalt.err (!%p3369_p2)
}
   0x9   :  { %s3373_s27 = scalar_lea.vmem %s31_s19, 6144  ;;  %p3378_p4 = scmp.lt.s32.totalorder %s31_s19, %s31_s19 }
   0xa   :  { %p3374_p3 = scmp.ne.s32.totalorder %s31_s19, %s3373_s27  ;;  %p3379_p5 = scmp.lt.s32.totalorder %s3373_s27, %s3373_s27 }
   0xc   :  { %p3380_p6 = por %p3379_p5, %p3378_p4 }
   0xe   :  { %p3381_p7 = pnand %p3380_p6, %p3374_p3 }
  0x10   :  { %3384 = shalt.err (!%p3381_p7)
}
  0x11   :  { %s3458_s28 = smov 384   ;;  %s3459_s29 = smov 24  }
  0x12   :  { %36 = dma.hbm_to_vmem [thread:$0]  %s3969_s1, 6144, %s31_s19, [#allocation8], %s3458_s28, %s3458_s28, %s3459_s29  }
  0x13   :  { %s3460_s7 = smov [#allocation4]   ;;  %s3385_s11 = scalar_lea.hbm %s3968_s0, 1024 }
  0x14   :  { %s18_s8 = sshll.u32 %s3460_s7, 4  ;;  %p3386_p8 = scmp.ne.s32.totalorder %s3968_s0, %s3385_s11  ;;  %s19_s8 = int_to_ptr.vmem [resolvable:$true] %s18_s8 }
  0x15   :  { %p3389_p9 = scmp.lt.u32.totalorder %s3385_s11, %s3968_s0 }
  0x17   :  { %p3391_p10 = pnand %p3389_p9, %p3386_p8 }
  0x19   :  { %3394 = shalt.err (!%p3391_p10)
}
  0x1a   :  { %s3395_s16 = scalar_lea.vmem %s19_s8, 1024  ;;  %p3400_p12 = scmp.lt.s32.totalorder %s19_s8, %s19_s8 }
  0x1b   :  { %p3396_p11 = scmp.ne.s32.totalorder %s19_s8, %s3395_s16  ;;  %p3401_p13 = scmp.lt.s32.totalorder %s3395_s16, %s3395_s16 }
  0x1d   :  { %p3402_p0 = por %p3401_p13, %p3400_p12 }
  0x1f   :  { %p3403_p1 = pnand %p3402_p0, %p3396_p11 }
  0x21   :  { %3406 = shalt.err (!%p3403_p1)
}
  0x22   :  { %s3461_s1 = smov 128   ;;  %s3462_s17 = smov 8  }
  0x23   :  { %24 = dma.hbm_to_vmem [thread:$0]  %s3968_s0, 1024, %s19_s8, [#allocation5], %s3461_s1, %s3461_s1, %s3462_s17  }
  0x24   :  { %s3463_s20 = smov [#allocation9]   ;;  %s3407_s24 = scalar_lea.hbm %s3970_s2, 3072 }
  0x25   :  { %s42_s21 = sshll.u32 %s3463_s20, 4  ;;  %p3408_p2 = scmp.ne.s32.totalorder %s3970_s2, %s3407_s24  ;;  %s43_s21 = int_to_ptr.vmem [resolvable:$true] %s42_s21 }
  0x26   :  { %p3411_p3 = scmp.lt.u32.totalorder %s3407_s24, %s3970_s2 }
  0x28   :  { %p3413_p4 = pnand %p3411_p3, %p3408_p2 }
  0x2a   :  { %3416 = shalt.err (!%p3413_p4)
}
  0x2b   :  { %s3417_s29 = scalar_lea.vmem %s43_s21, 3072  ;;  %p3422_p6 = scmp.lt.s32.totalorder %s43_s21, %s43_s21 }
  0x2c   :  { %p3418_p5 = scmp.ne.s32.totalorder %s43_s21, %s3417_s29  ;;  %p3423_p7 = scmp.lt.s32.totalorder %s3417_s29, %s3417_s29 }
  0x2e   :  { %p3424_p8 = por %p3423_p7, %p3422_p6 }
  0x30   :  { %p3425_p9 = pnand %p3424_p8, %p3418_p5 }
  0x32   :  { %3428 = shalt.err (!%p3425_p9)
}
  0x33   :  { %s3464_s0 = smov 192   ;;  %s3465_s30 = smov 12  }
  0x34   :  { %48 = dma.hbm_to_vmem [thread:$0]  %s3970_s2, 3072, %s43_s21, [#allocation8], %s3464_s0, %s3464_s0, %s3465_s30  }
  0x35   :  { %3451 = dma.done.wait [#allocation5], 1024  }
  0x36   :  { %3452 = vsyncadd [#allocation5], 4294966272 }
  0x37   :  { %3453 = dma.done.wait [#allocation8], 9216  }
  0x38   :  { %3454 = vsyncadd [#allocation8], 4294958080  ;;  %v3466_v0 = vmov 0.0   ;;  %v77_v1 = vld [vmem:[#allocation7 + $0x8] sm:$0xff]  ;;  %v80_v2 = vld [vmem:[#allocation7 + $0x20] sm:$0xff]  ;;  %vm3467_vm0 = vmmov 0  }
  0x39   :  { %205 = vmatprep.mubr.f32.mxu0 %v3466_v0  ;;  %v76_v3 = vld [vmem:[#allocation7] sm:$0xff]  ;;  %v3093_v4 = vpack.c.bf16 %v80_v2, %v77_v1  ;;  %v79_v5 = vld [vmem:[#allocation7 + $0x18] sm:$0xff]  ;;  %v86_v7 = vld [vmem:[#allocation7 + $0x50] sm:$0xff] }
  0x3a   :  { %v83_v6 = vld [vmem:[#allocation7 + $0x38] sm:$0xff]  ;;  %v3095_v8 = vpack.c.bf16 %v79_v5, %v76_v3  ;;  %v82_v10 = vld [vmem:[#allocation7 + $0x30] sm:$0xff]  ;;  %v85_v11 = vld [vmem:[#allocation7 + $0x48] sm:$0xff] }
  0x3b   :  { %v3097_v9 = vpack.c.bf16 %v86_v7, %v83_v6  ;;  %v89_v12 = vld [vmem:[#allocation7 + $0x68] sm:$0xff]  ;;  %3094 = vmatprep.subr.bf16.mxu0 %v3093_v4  ;;  %v92_v13 = vld [vmem:[#allocation7 + $0x80] sm:$0xff]  ;;  %v3099_v14 = vpack.c.bf16 %v85_v11, %v82_v10  ;;  %v91_v17 = vld [vmem:[#allocation7 + $0x78] sm:$0xff] }
  0x3c   :  { %3096 = vmatpush1.bf16.msra.mxu0 %v3095_v8  ;;  %v3101_v15 = vpack.c.bf16 %v92_v13, %v89_v12  ;;  %v88_v16 = vld [vmem:[#allocation7 + $0x60] sm:$0xff]  ;;  %v95_v18 = vld [vmem:[#allocation7 + $0x98] sm:$0xff]  ;;  %v98_v19 = vld [vmem:[#allocation7 + $0xb0] sm:$0xff] }
  0x3d   :  { %3098 = vmatprep.subr.bf16.mxu0 %v3097_v9  ;;  %v3103_v20 = vpack.c.bf16 %v91_v17, %v88_v16  ;;  %v78_v21 = vld [vmem:[#allocation7 + $0x10] sm:$0xff]  ;;  %v3105_v22 = vpack.c.bf16 %v98_v19, %v95_v18  ;;  %v97_v24 = vld [vmem:[#allocation7 + $0xa8] sm:$0xff]  ;;  %v104_v27 = vld [vmem:[#allocation7 + $0xe0] sm:$0xff] }
  0x3e   :  { %v94_v23 = vld [vmem:[#allocation7 + $0x90] sm:$0xff]  ;;  %v81_v25 = vld [vmem:[#allocation7 + $0x28] sm:$0xff]  ;;  %v84_v29 = vld [vmem:[#allocation7 + $0x40] sm:$0xff] }
  0x3f   :  { %v101_v26 = vld [vmem:[#allocation7 + $0xc8] sm:$0xff]  ;;  %v3125_v28 = vpack.c.bf16 %v81_v25, %v78_v21  ;;  %v100_v30 = vld [vmem:[#allocation7 + $0xc0] sm:$0xff]  ;;  %v87_v31 = vld [vmem:[#allocation7 + $0x58] sm:$0xff]  ;;  %v3107_v32 = vpack.c.bf16 %v97_v24, %v94_v23 }
  0x40   :  { %3100 = vmatpush1.bf16.msra.mxu0 %v3099_v14  ;;  %v103_v33 = vld [vmem:[#allocation7 + $0xd8] sm:$0xff]  ;;  %v3129_v34 = vpack.c.bf16 %v87_v31, %v84_v29  ;;  %v90_v35 = vld [vmem:[#allocation7 + $0x70] sm:$0xff]  ;;  %v93_v36 = vld [vmem:[#allocation7 + $0x88] sm:$0xff]  ;;  %v3109_v37 = vpack.c.bf16 %v104_v27, %v101_v26 }
  0x41   :  { %3102 = vmatprep.subr.bf16.mxu0 %v3101_v15  ;;  %3126 = vmatprep.subr.bf16.mxu1 %v3125_v28  ;;  %v68_v38 = vld [vmem:[#allocation4] sm:$0xff]  ;;  %v107_v39 = vld [vmem:[#allocation7 + $0xf8] sm:$0xff]  ;;  %v110_v40 = vld [vmem:[#allocation7 + $0x110] sm:$0xff]  ;;  %v3133_v41 = vpack.c.bf16 %v93_v36, %v90_v35  ;;  %v3111_v44 = vpack.c.bf16 %v103_v33, %v100_v30 }
  0x42   :  { %3128 = vmatpush3.bf16.msra.mxu1 %v3125_v28  ;;  %v96_v42 = vld [vmem:[#allocation7 + $0xa0] sm:$0xff]  ;;  %2921 = vmatprep.mubr.f32.mxu1 %v68_v38  ;;  %v99_v43 = vld [vmem:[#allocation7 + $0xb8] sm:$0xff]  ;;  %v3113_v45 = vpack.c.bf16 %v110_v40, %v107_v39  ;;  %v106_v46 = vld [vmem:[#allocation7 + $0xf0] sm:$0xff]  ;;  %v3468_v40 = vmov 0  }
  0x43   :  { %3130 = vmatprep.subr.bf16.mxu1 %v3129_v34  ;;  %v109_v47 = vld [vmem:[#allocation7 + $0x108] sm:$0xff]  ;;  %v116_v49 = vld [vmem:[#allocation7 + $0x140] sm:$0xff]  ;;  %v3137_v50 = vpack.c.bf16 %v99_v43, %v96_v42  ;;  %v102_v51 = vld [vmem:[#allocation7 + $0xd0] sm:$0xff]  ;;  %v3469_v42 = vmov 0.0|0.0  }
  0x44   :  { %3104 = vmatpush1.bf16.msra.mxu0 %v3103_v20  ;;  %v113_v48 = vld [vmem:[#allocation7 + $0x128] sm:$0xff]  ;;  %v3115_v53 = vpack.c.bf16 %v109_v47, %v106_v46  ;;  %v112_v55 = vld [vmem:[#allocation7 + $0x120] sm:$0xff]  ;;  %v115_v56 = vld [vmem:[#allocation7 + $0x138] sm:$0xff] }
  0x45   :  { %3106 = vmatprep.subr.bf16.mxu0 %v3105_v22  ;;  %v105_v52 = vld [vmem:[#allocation7 + $0xe8] sm:$0xff]  ;;  %v3117_v54 = vpack.c.bf16 %v116_v49, %v113_v48  ;;  %v119_v57 = vld [vmem:[#allocation7 + $0x158] sm:$0xff]  ;;  %v122_v58 = vld [vmem:[#allocation7 + $0x170] sm:$0xff]  ;;  %v3119_v62 = vpack.c.bf16 %v115_v56, %v112_v55 }
  0x46   :  { %3132 = vmatpush3.bf16.msra.mxu1 %v3129_v34  ;;  %v3141_v59 = vpack.c.bf16 %v105_v52, %v102_v51  ;;  %v108_v60 = vld [vmem:[#allocation7 + $0x100] sm:$0xff]  ;;  %v111_v61 = vld [vmem:[#allocation7 + $0x118] sm:$0xff]  ;;  %v3121_v63 = vpack.c.bf16 %v122_v58, %v119_v57  ;;  %v118_v1 = vld [vmem:[#allocation7 + $0x150] sm:$0xff]  ;;  %v126_v52 = vlaneseq }
  0x47   :  { %3134 = vmatprep.subr.bf16.mxu1 %v3133_v41  ;;  %v121_v2 = vld [vmem:[#allocation7 + $0x168] sm:$0xff]  ;;  %v3145_v3 = vpack.c.bf16 %v111_v61, %v108_v60  ;;  %v114_v4 = vld [vmem:[#allocation7 + $0x130] sm:$0xff]  ;;  %v120_v9 = vld [vmem:[#allocation7 + $0x160] sm:$0xff] }
  0x48   :  { %3108 = vmatpush1.bf16.msra.mxu0 %v3107_v32  ;;  %v117_v5 = vld [vmem:[#allocation7 + $0x148] sm:$0xff]  ;;  %v3123_v6 = vpack.c.bf16 %v121_v2, %v118_v1  ;;  %v3541_v7 = vld [vmem:[#allocation9 + $0x4] ss:$12 sps:$4 sm:$0xff]   ;;  %v123_v10 = vld [vmem:[#allocation7 + $0x178] sm:$0xff] }
  0x49   :  { %3110 = vmatprep.subr.bf16.mxu0 %v3109_v37  ;;  %v3149_v8 = vpack.c.bf16 %v117_v5, %v114_v4  ;;  %v3543_v11 = vld [vmem:[#allocation9] ss:$12 sps:$4 sm:$0xff]   ;;  %v3546_v12 = vld [vmem:[#allocation9 + $0x1c] ss:$12 sps:$4 sm:$0xff]   ;;  %v3153_v13 = vpack.c.bf16 %v123_v10, %v120_v9  ;;  %v3550_v15 = vld [vmem:[#allocation9 + $0x18] ss:$12 sps:$4 sm:$0xff]  }
  0x4a   :  { %3136 = vmatpush3.bf16.msra.mxu1 %v3133_v41  ;;  %v69_v14 = vld [vmem:[#allocation4 + $0x8] sm:$0xff]  ;;  %v3553_v16 = vld [vmem:[#allocation9 + $0x34] ss:$12 sps:$4 sm:$0xff]   ;;  %v3555_v18 = vld [vmem:[#allocation9 + $0x30] ss:$12 sps:$4 sm:$0xff]  }
  0x4b   :  { %3138 = vmatprep.subr.bf16.mxu1 %v3137_v50  ;;  %v70_v17 = vld [vmem:[#allocation4 + $0x10] sm:$0xff]  ;;  %v3557_v19 = vld [vmem:[#allocation9 + $0x4c] ss:$12 sps:$4 sm:$0xff]   ;;  %v72_v25 = vld [vmem:[#allocation4 + $0x20] sm:$0xff] }
  0x4c   :  { %3112 = vmatpush1.bf16.msra.mxu0 %v3111_v44  ;;  %v3192_v20 = vld [vmem:[#allocation9 + $0x8] ss:$12 sps:$4 sm:$0xff]   ;;  %v71_v21 = vld [vmem:[#allocation4 + $0x18] sm:$0xff]  ;;  %v3565_v23 = vld [vmem:[#allocation9 + $0x64] ss:$12 sps:$4 sm:$0xff]  }
  0x4d   :  { %3114 = vmatprep.subr.bf16.mxu0 %v3113_v45  ;;  %v3562_v22 = vld [vmem:[#allocation9 + $0x48] ss:$12 sps:$4 sm:$0xff]   ;;  %v3196_v24 = vld [vmem:[#allocation9 + $0x20] ss:$12 sps:$4 sm:$0xff]   ;;  %v3197_v28 = vld [vmem:[#allocation9 + $0x38] ss:$12 sps:$4 sm:$0xff]  }
  0x4e   :  { %3140 = vmatpush3.bf16.msra.mxu1 %v3137_v50  ;;  %v3570_v26 = vld [vmem:[#allocation9 + $0x60] ss:$12 sps:$4 sm:$0xff]   ;;  %v3572_v27 = vld [vmem:[#allocation9 + $0x7c] ss:$12 sps:$4 sm:$0xff]   ;;  %v3578_v30 = vld [vmem:[#allocation9 + $0x78] ss:$12 sps:$4 sm:$0xff]  }
  0x4f   :  { %3142 = vmatprep.subr.bf16.mxu1 %v3141_v59  ;;  %v73_v29 = vld [vmem:[#allocation4 + $0x28] sm:$0xff]  ;;  %v74_v31 = vld [vmem:[#allocation4 + $0x30] sm:$0xff]  ;;  %v75_v35 = vld [vmem:[#allocation4 + $0x38] sm:$0xff] }
  0x50   :  { %3116 = vmatpush1.bf16.msra.mxu0 %v3115_v53  ;;  %v3580_v32 = vld [vmem:[#allocation9 + $0x94] ss:$12 sps:$4 sm:$0xff]   ;;  %v3198_v33 = vld [vmem:[#allocation9 + $0x50] ss:$12 sps:$4 sm:$0xff]   ;;  %v3588_v36 = vld [vmem:[#allocation9 + $0xac] ss:$12 sps:$4 sm:$0xff]  }
  0x51   :  { %3118 = vmatprep.subr.bf16.mxu0 %v3117_v54  ;;  %v3586_v34 = vld [vmem:[#allocation9 + $0x90] ss:$12 sps:$4 sm:$0xff]   ;;  %v3199_v37 = vld [vmem:[#allocation9 + $0x68] ss:$12 sps:$4 sm:$0xff]   ;;  %v3200_v39 = vld [vmem:[#allocation9 + $0x80] ss:$12 sps:$4 sm:$0xff]  }
  0x52   :  { %3144 = vmatpush3.bf16.msra.mxu1 %v3141_v59  ;;  %v3201_v41 = vld [vmem:[#allocation9 + $0x98] ss:$12 sps:$4 sm:$0xff]   ;;  %v3202_v43 = vld [vmem:[#allocation9 + $0xb0] ss:$12 sps:$4 sm:$0xff]   ;;  %v3203_v44 = vld [vmem:[#allocation9 + $0x8] ss:$12 sps:$4 sm:$0xff]  }
  0x53   :  { %3146 = vmatprep.subr.bf16.mxu1 %v3145_v3  ;;  %v3204_v45 = vld [vmem:[#allocation9 + $0x20] ss:$12 sps:$4 sm:$0xff]   ;;  %v3205_v46 = vld [vmem:[#allocation9 + $0x38] ss:$12 sps:$4 sm:$0xff]   ;;  %v3206_v47 = vld [vmem:[#allocation9 + $0x50] ss:$12 sps:$4 sm:$0xff]  }
  0x54   :  { %3120 = vmatpush1.bf16.msra.mxu0 %v3119_v62  ;;  %v3207_v48 = vld [vmem:[#allocation9 + $0x68] ss:$12 sps:$4 sm:$0xff]   ;;  %v3208_v49 = vld [vmem:[#allocation9 + $0x80] ss:$12 sps:$4 sm:$0xff]   ;;  %v3209_v50 = vld [vmem:[#allocation9 + $0x98] ss:$12 sps:$4 sm:$0xff]  }
  0x55   :  { %3122 = vmatprep.subr.bf16.mxu0 %v3121_v63  ;;  %v3210_v51 = vld [vmem:[#allocation9 + $0xb0] ss:$12 sps:$4 sm:$0xff]   ;;  %v127_v53 = vshrl.u32 %v126_v52, 7  ;;  %v124_v55 = vld [vmem:[%s3971_s3] sm:$0x7] }
  0x56   :  { %3148 = vmatpush3.bf16.msra.mxu1 %v3145_v3 }
  0x57   :  { %3150 = vmatprep.subr.bf16.mxu1 %v3149_v8  ;;  %v128_v54 = vsub.s32 0, %v127_v53  ;;  %v132_v57 = vsub.s32 1, %v127_v53  ;;  %v136_v60 = vsub.s32 2, %v127_v53 }
  0x58   :  { %3124 = vmatpush1.bf16.msra.mxu0 %v3123_v6 }
  0x59   :  { %552 = vmatprep.subr.bf16.mxu0 %v3541_v7  ;;  %v129_v59 = vrot.slane %v124_v55, %v128_v54  ;;  %v133_v61 = vrot.slane %v124_v55, %v132_v57  ;;  %v3643_v3 = vrot.slane %v124_v55, %v136_v60 }
  0x5a   :  { %3152 = vmatpush3.bf16.msra.mxu1 %v3149_v8 }
  0x5b   :  { %206 = vmatmul.mubr.f32.vlgmr.msra.gmra.mrb[0].mxu0 %v68_v38  ;;  %3154 = vmatprep.subr.bf16.mxu1 %v3153_v13  ;;  %v3594_v38 = vld [vmem:[#allocation9 + $0xa8] ss:$12 sps:$4 sm:$0xff]  }
  0x5c   :  { %553 = vmatpush1.bf16.msra.mxu0 %v3543_v11  ;;  %211 = vmatprep.mubr.f32.mxu0 %v3466_v0 }
  0x5d   :  { %554 = vmatprep.subr.bf16.mxu0 %v3546_v12 }
  0x5e   :  { %3156 = vmatpush3.bf16.msra.mxu1 %v3153_v13 }
  0x5f   :  { %212 = vmatmul.mubr.f32.gmra.mrb[2].mxu0 %v69_v14  ;;  %2933 = vmatprep.subr.bf16.mxu1 %v3466_v0 }
  0x60   :  { %555 = vmatpush1.bf16.msra.mxu0 %v3550_v15  ;;  %217 = vmatprep.mubr.f32.mxu0 %v3466_v0 }
  0x61   :  { %556 = vmatprep.subr.bf16.mxu0 %v3553_v16  ;;  %2922 = vmatmul.mubr.f32.vlgmr.msra.gmra.mrb[0].mxu1 %v69_v14 }
  0x62   :  { %2934 = vmatpush3.bf16.msra.mxu1 %v3192_v20  ;;  %2924 = vmatprep.mubr.f32.mxu1 %v70_v17 }
  0x63   :  { %218 = vmatmul.mubr.f32.gmra.mrb[4].mxu0 %v70_v17  ;;  %2935 = vmatprep.subr.bf16.mxu1 %v3466_v0 }
  0x64   :  { %557 = vmatpush1.bf16.msra.mxu0 %v3555_v18  ;;  %223 = vmatprep.mubr.f32.mxu0 %v3466_v0 }
  0x65   :  { %558 = vmatprep.subr.bf16.mxu0 %v3557_v19  ;;  %2925 = vmatmul.mubr.f32.gmra.mrb[2].mxu1 %v71_v21 }
  0x66   :  { %2936 = vmatpush3.bf16.msra.mxu1 %v3196_v24  ;;  %2927 = vmatprep.mubr.f32.mxu1 %v72_v25 }
  0x67   :  { %224 = vmatmul.mubr.f32.gmra.mrb[6].mxu0 %v71_v21  ;;  %2937 = vmatprep.subr.bf16.mxu1 %v3466_v0 }
  0x68   :  { %559 = vmatpush1.bf16.msra.mxu0 %v3562_v22  ;;  %229 = vmatprep.mubr.f32.mxu0 %v3466_v0 }
  0x69   :  { %560 = vmatprep.subr.bf16.mxu0 %v3565_v23  ;;  %2928 = vmatmul.mubr.f32.gmra.mrb[4].mxu1 %v73_v29 }
  0x6a   :  { %2938 = vmatpush3.bf16.msra.mxu1 %v3197_v28  ;;  %2930 = vmatprep.mubr.f32.mxu1 %v74_v31 }
  0x6b   :  { %230 = vmatmul.mubr.f32.gmra.mrb[8].mxu0 %v72_v25  ;;  %2939 = vmatprep.subr.bf16.mxu1 %v3466_v0 }
  0x6c   :  { %561 = vmatpush1.bf16.msra.mxu0 %v3570_v26  ;;  %235 = vmatprep.mubr.f32.mxu0 %v3466_v0 }
  0x6d   :  { %562 = vmatprep.subr.bf16.mxu0 %v3572_v27  ;;  %2931 = vmatmul.mubr.f32.gmra.mrb[6].mxu1 %v75_v35 }
  0x6e   :  { %2940 = vmatpush3.bf16.msra.mxu1 %v3198_v33  ;;  %2949 = vmatprep.mubr.msk.bf16.mxu1 %vm3467_vm0, %v3466_v0 }
  0x6f   :  { %236 = vmatmul.mubr.f32.gmra.mrb[10].mxu0 %v73_v29  ;;  %2941 = vmatprep.subr.bf16.mxu1 %v3466_v0 }
  0x70   :  { %563 = vmatpush1.bf16.msra.mxu0 %v3578_v30  ;;  %241 = vmatprep.mubr.f32.mxu0 %v3466_v0 }
  0x71   :  { %564 = vmatprep.subr.bf16.mxu0 %v3580_v32 }
  0x72   :  { %2942 = vmatpush3.bf16.msra.mxu1 %v3199_v37 }
  0x73   :  { %242 = vmatmul.mubr.f32.gmra.mrb[12].mxu0 %v74_v31  ;;  %2943 = vmatprep.subr.bf16.mxu1 %v3466_v0 }
  0x74   :  { %565 = vmatpush1.bf16.msra.mxu0 %v3586_v34  ;;  %247 = vmatprep.mubr.f32.mxu0 %v3466_v0 }
  0x75   :  { %566 = vmatprep.subr.bf16.mxu0 %v3588_v36 }
  0x76   :  { %2944 = vmatpush3.bf16.msra.mxu1 %v3200_v39 }
  0x77   :  { %248 = vmatmul.mubr.f32.gmra.mrb[14].mxu0 %v75_v35  ;;  %2945 = vmatprep.subr.bf16.mxu1 %v3466_v0 }
  0x78   :  { %567 = vmatpush1.bf16.msra.mxu0 %v3594_v38  ;;  %584 = vmatprep.mubr.bf16.mxu0 %v3468_v40 }
  0x79   :  { %822 = vmatprep.subr.bf16.mxu0 %v3541_v7 }
  0x7a   :  { %2946 = vmatpush3.bf16.msra.mxu1 %v3201_v41 }
  0x7b   :  { %585 = vmatmul.mubr.bf16.vlgmr.msra.gmra.mrb[16].mxu0 %v3469_v42  ;;  %2947 = vmatprep.subr.bf16.mxu1 %v3466_v0 }
  0x7c   :  { %823 = vmatpush1.bf16.msra.mxu0 %v3543_v11  ;;  %854 = vmatprep.mubr.bf16.mxu0 %v3468_v40 }
  0x7d   :  { %824 = vmatprep.subr.bf16.mxu0 %v3546_v12 }
  0x7e   :  { %2948 = vmatpush3.bf16.msra.mxu1 %v3202_v43 }
  0x7f   :  { %2953 = vmatprep.subr.bf16.mxu1 %v3466_v0 }
  0x80   :  { %825 = vmatpush1.bf16.msra.mxu0 %v3550_v15 }
  0x81   :  { %826 = vmatprep.subr.bf16.mxu0 %v3553_v16  ;;  %2950 = vmatmul.mubr.bf16.vlgmr.msra.gmra.mrb[8].mxu1 %v3469_v42 }
  0x82   :  { %2969 = vmatprep.mubr.msk.bf16.mxu1 %vm3467_vm0, %v3466_v0  ;;  %2954 = vmatpush3.bf16.msra.mxu1 %v3203_v44 }
  0x83   :  { %2955 = vmatprep.subr.bf16.mxu1 %v3466_v0 }
  0x84   :  { %827 = vmatpush1.bf16.msra.mxu0 %v3555_v18 }
  0x85   :  { %828 = vmatprep.subr.bf16.mxu0 %v3557_v19 }
  0x86   :  { %2956 = vmatpush3.bf16.msra.mxu1 %v3204_v45 }
  0x87   :  { %2957 = vmatprep.subr.bf16.mxu1 %v3466_v0 }
  0x88   :  { %829 = vmatpush1.bf16.msra.mxu0 %v3562_v22 }
  0x89   :  { %830 = vmatprep.subr.bf16.mxu0 %v3565_v23 }
  0x8a   :  { %2958 = vmatpush3.bf16.msra.mxu1 %v3205_v46 }
  0x8b   :  { %2959 = vmatprep.subr.bf16.mxu1 %v3466_v0 }
  0x8c   :  { %831 = vmatpush1.bf16.msra.mxu0 %v3570_v26 }
  0x8d   :  { %832 = vmatprep.subr.bf16.mxu0 %v3572_v27 }
  0x8e   :  { %2960 = vmatpush3.bf16.msra.mxu1 %v3206_v47 }
  0x8f   :  { %2961 = vmatprep.subr.bf16.mxu1 %v3466_v0 }
  0x90   :  { %833 = vmatpush1.bf16.msra.mxu0 %v3578_v30 }
  0x91   :  { %834 = vmatprep.subr.bf16.mxu0 %v3580_v32 }
  0x92   :  { %2962 = vmatpush3.bf16.msra.mxu1 %v3207_v48 }
  0x93   :  { %2963 = vmatprep.subr.bf16.mxu1 %v3466_v0 }
  0x94   :  { %835 = vmatpush1.bf16.msra.mxu0 %v3586_v34 }
  0x95   :  { %836 = vmatprep.subr.bf16.mxu0 %v3588_v36 }
  0x96   :  { %2964 = vmatpush3.bf16.msra.mxu1 %v3208_v49 }
  0x97   :  { %2965 = vmatprep.subr.bf16.mxu1 %v3466_v0 }
  0x98   :  { %837 = vmatpush1.bf16.msra.mxu0 %v3594_v38 }
  0x99   :  { %1093 = vmatprep.subr.bf16.mxu0 %v3541_v7 }
  0x9a   :  { %2966 = vmatpush3.bf16.msra.mxu1 %v3209_v50 }
  0x9b   :  { %2967 = vmatprep.subr.bf16.mxu1 %v3466_v0 }
  0x9e   :  { %2968 = vmatpush3.bf16.msra.mxu1 %v3210_v51 }
  0x9f   :  { %2973 = vmatprep.subr.bf16.mxu1 %v3466_v0 }
 0x12e   :  { %v207_v56 = vpop.f32.mrb[0].mxu0 }
 0x12f   :  { %v209_v58 = vpop.f32.mrb[1].mxu0 }
 0x132   :  { %v213_v62 = vpop.f32.mrb[2].mxu0 }
 0x133   :  { %v3639_v63 = vadd.f32 %v213_v62, %v129_v59  ;;  %v215_v1 = vpop.f32.mrb[3].mxu0 }
 0x134   :  { %v3641_v2 = vadd.f32 %v215_v1, %v133_v61  ;;  %v2923_v9 = vpop.f32.mrb[0].mxu1 }
 0x135   :  { %v3650_v10 = vadd.f32 %v2923_v9, %v3643_v3  ;;  %v320_v13 = vpop.f32.mrb[1].mxu1 }
 0x136   :  { %v219_v4 = vpop.f32.mrb[4].mxu0 }
 0x137   :  { %v3645_v5 = vadd.f32 %v219_v4, %v129_v59  ;;  %v221_v6 = vpop.f32.mrb[5].mxu0  ;;  %v208_v4 = vadd.f32 %v207_v56, %v129_v59  ;;  %v3693_v56 = vld [vmem:[%s3972_s4] ss:$0 sm:$0xff]  ;;  %s3470_s4 = smov [#allocation10]  }
 0x138   :  { %v3647_v8 = vadd.f32 %v221_v6, %v133_v61  ;;  %v2926_v24 = vpop.f32.mrb[2].mxu1  ;;  %v210_v6 = vadd.f32 %v209_v58, %v133_v61  ;;  %s2564_s10 = sshll.u32 %s3470_s4, 4  ;;  %s2565_s10 = int_to_ptr.vmem [resolvable:$true] %s2564_s10 }
 0x139   :  { %v3657_v25 = vadd.f32 %v2926_v24, %v3643_v3  ;;  %v330_v28 = vpop.f32.mrb[3].mxu1  ;;  %s3429_s11 = scalar_lea.vmem %s2565_s10, 1024  ;;  %p3434_p11 = scmp.lt.s32.totalorder %s2565_s10, %s2565_s10 }
 0x13a   :  { %v225_v14 = vpop.f32.mrb[6].mxu0  ;;  %v3660_v31 = vadd.f32 %v330_v28, %v3643_v3  ;;  %p3430_p10 = scmp.ne.s32.totalorder %s2565_s10, %s3429_s11  ;;  %p3435_p12 = scmp.lt.s32.totalorder %s3429_s11, %s3429_s11 }
 0x13b   :  { %v3652_v17 = vadd.f32 %v225_v14, %v129_v59  ;;  %v227_v20 = vpop.f32.mrb[7].mxu0 }
 0x13c   :  { %v3654_v21 = vadd.f32 %v227_v20, %v133_v61  ;;  %v2929_v39 = vpop.f32.mrb[4].mxu1  ;;  %p3436_p13 = por %p3435_p12, %p3434_p11 }
 0x13d   :  { %v3667_v41 = vadd.f32 %v2929_v39, %v3643_v3  ;;  %v340_v42 = vpop.f32.mrb[5].mxu1 }
 0x13e   :  { %v231_v29 = vpop.f32.mrb[8].mxu0  ;;  %v3670_v44 = vadd.f32 %v340_v42, %v3643_v3  ;;  %p3437_p0 = pnand %p3436_p13, %p3430_p10 }
 0x13f   :  { %v3662_v33 = vadd.f32 %v231_v29, %v129_v59  ;;  %v233_v35 = vpop.f32.mrb[9].mxu0 }
 0x140   :  { %v3664_v37 = vadd.f32 %v233_v35, %v133_v61  ;;  %v2932_v48 = vpop.f32.mrb[6].mxu1 }
 0x141   :  { %v3677_v49 = vadd.f32 %v2932_v48, %v3643_v3  ;;  %v350_v50 = vpop.f32.mrb[7].mxu1 }
 0x142   :  { %v237_v43 = vpop.f32.mrb[10].mxu0  ;;  %v3680_v52 = vadd.f32 %v350_v50, %v3643_v3 }
 0x143   :  { %v3672_v45 = vadd.f32 %v237_v43, %v129_v59  ;;  %v239_v46 = vpop.f32.mrb[11].mxu0 }
 0x144   :  { %v3674_v47 = vadd.f32 %v239_v46, %v133_v61 }
 0x146   :  { %v243_v51 = vpop.f32.mrb[12].mxu0 }
 0x147   :  { %v3682_v53 = vadd.f32 %v243_v51, %v129_v59  ;;  %v245_v54 = vpop.f32.mrb[13].mxu0 }
 0x148   :  { %v3684_v55 = vadd.f32 %v245_v54, %v133_v61  ;;  %v321_v54 = vadd.f32 %v320_v13, %v3643_v3  ;;  %v3211_v3 = vld [vmem:[#allocation9 + $0x8] ss:$12 sps:$4 sm:$0xff]   ;;  %v3212_v13 = vld [vmem:[#allocation9 + $0x20] ss:$12 sps:$4 sm:$0xff]  }
 0x14a   :  { %v249_v57 = vpop.f32.mrb[14].mxu0 }
 0x14b   :  { %v3686_v60 = vadd.f32 %v249_v57, %v129_v59  ;;  %v251_v62 = vpop.f32.mrb[15].mxu0 }
 0x14c   :  { %v3688_v1 = vadd.f32 %v251_v62, %v133_v61 }
 0x14e   :  { %v586_v9 = vpop.f32.mrb[16].mxu0 }
 0x14f   :  { %v639_v14 = vadd.f32 %v586_v9, %v208_v4  ;;  %v588_v20 = vpop.f32.mrb[17].mxu0 }
 0x150   :  { %v646_v24 = vadd.f32 %v588_v20, %v210_v6  ;;  %v590_v28 = vpop.f32.mrb[18].mxu0 }
 0x151   :  { %v2609_v29 = vmul.f32 -1.442695, %v639_v14  ;;  %v591_v35 = vpop.f32.mrb[19].mxu0 }
 0x152   :  { %v2610_v46 = vmul.f32 -1.442695, %v646_v24  ;;  %v3214_v35 = vld [vmem:[#allocation9 + $0x50] ss:$12 sps:$4 sm:$0xff]  }
 0x153   :  { %3283 = vpow2.f32 %v2609_v29  ;;  %v3213_v29 = vld [vmem:[#allocation9 + $0x38] ss:$12 sps:$4 sm:$0xff]  }
 0x154   :  { %v627_v39 = vpop.f32.mrb[8].mxu1  ;;  %3285 = vpow2.f32 %v2610_v46 }
 0x155   :  { %v2951_v42 = vpop.f32.mrb[9].mxu1  ;;  %v653_v58 = vadd.f32 %v3693_v56, %v627_v39  ;;  %v3215_v39 = vld [vmem:[#allocation9 + $0x68] ss:$12 sps:$4 sm:$0xff]  }
 0x156   :  { %v630_v43 = vpop.f32.mrb[10].mxu1  ;;  %v3216_v42 = vld [vmem:[#allocation9 + $0x80] ss:$12 sps:$4 sm:$0xff]  }
 0x157   :  { %v2952_v48 = vpop.f32.mrb[11].mxu1  ;;  %v3218_v43 = vld [vmem:[#allocation9 + $0xb0] ss:$12 sps:$4 sm:$0xff]  }
 0x15d   :  { %v3284_v50 = vpop.eup %3283 }
 0x15e   :  { %v643_v51 = vadd.f32 1.0, %v3284_v50  ;;  %v3286_v59 = vpop.eup %3285 }
 0x15f   :  { %v650_v62 = vadd.f32 1.0, %v3286_v59 }
 0x160   :  { %3287 = vrcp.f32 %v643_v51 }
 0x16a   :  { %v3288_v61 = vpop.eup %3287 }
 0x16b   :  { %v654_v57 = vmul.f32 %v3288_v61, %v653_v58 }
 0x16d   :  { %v655_v4 = vadd.f32 %v654_v57, %v321_v54 }
 0x16f   :  { %3289 = vtanh.f32 %v655_v4 }
 0x170   :  { %3291 = vrcp.f32 %v650_v62 }
 0x179   :  { %v3290_v6 = vpop.eup %3289 }
 0x17a   :  { %v657_v9 = vsub.f32 0.0, %v3290_v6  ;;  %v3292_v14 = vpop.eup %3291 }
 0x17c   :  { %v658_v20 = vmul.f32 %v3292_v14, %v657_v9 }
 0x17e   :  { %v3697_v24 = vadd.f32 %v3290_v6, %v658_v20 }
 0x180   :  { %660 = vst [vmem:[#allocation10] sm:$0xff] %v3697_v24  ;;  %v661_v28 = vpack.c.bf16 %v3697_v24, %v3697_v24 }
 0x182   :  { %855 = vmatmul.mubr.bf16.vlgmr.msra.gmra.mrb[20].mxu0 %v661_v28  ;;  %2970 = vmatmul.mubr.bf16.vlgmr.msra.gmra.mrb[12].mxu1 %v661_v28 }
 0x183   :  { %1094 = vmatpush1.bf16.msra.mxu0 %v3543_v11  ;;  %1125 = vmatprep.mubr.bf16.mxu0 %v3468_v40 }
 0x184   :  { %1095 = vmatprep.subr.bf16.mxu0 %v3546_v12  ;;  %2989 = vmatprep.mubr.msk.bf16.mxu1 %vm3467_vm0, %v3466_v0 }
 0x185   :  { %2974 = vmatpush3.bf16.msra.mxu1 %v3211_v3 }
 0x186   :  { %2975 = vmatprep.subr.bf16.mxu1 %v3466_v0 }
 0x187   :  { %1096 = vmatpush1.bf16.msra.mxu0 %v3550_v15 }
 0x188   :  { %1097 = vmatprep.subr.bf16.mxu0 %v3553_v16 }
 0x189   :  { %2976 = vmatpush3.bf16.msra.mxu1 %v3212_v13 }
 0x18a   :  { %2977 = vmatprep.subr.bf16.mxu1 %v3466_v0 }
 0x18b   :  { %1098 = vmatpush1.bf16.msra.mxu0 %v3555_v18 }
 0x18c   :  { %1099 = vmatprep.subr.bf16.mxu0 %v3557_v19 }
 0x18d   :  { %2978 = vmatpush3.bf16.msra.mxu1 %v3213_v29 }
 0x18e   :  { %2979 = vmatprep.subr.bf16.mxu1 %v3466_v0 }
 0x18f   :  { %1100 = vmatpush1.bf16.msra.mxu0 %v3562_v22 }
 0x190   :  { %1101 = vmatprep.subr.bf16.mxu0 %v3565_v23 }
 0x191   :  { %2980 = vmatpush3.bf16.msra.mxu1 %v3214_v35 }
 0x192   :  { %2981 = vmatprep.subr.bf16.mxu1 %v3466_v0 }
 0x193   :  { %1102 = vmatpush1.bf16.msra.mxu0 %v3570_v26 }
 0x194   :  { %1103 = vmatprep.subr.bf16.mxu0 %v3572_v27 }
 0x195   :  { %2982 = vmatpush3.bf16.msra.mxu1 %v3215_v39 }
 0x196   :  { %2983 = vmatprep.subr.bf16.mxu1 %v3466_v0 }
 0x197   :  { %1104 = vmatpush1.bf16.msra.mxu0 %v3578_v30 }
 0x198   :  { %1105 = vmatprep.subr.bf16.mxu0 %v3580_v32 }
 0x199   :  { %2984 = vmatpush3.bf16.msra.mxu1 %v3216_v42 }
 0x19a   :  { %2985 = vmatprep.subr.bf16.mxu1 %v3466_v0 }
 0x19b   :  { %1106 = vmatpush1.bf16.msra.mxu0 %v3586_v34 }
 0x19c   :  { %1107 = vmatprep.subr.bf16.mxu0 %v3588_v36 }
 0x19f   :  { %1108 = vmatpush1.bf16.msra.mxu0 %v3594_v38 }
 0x1a0   :  { %1364 = vmatprep.subr.bf16.mxu0 %v3541_v7  ;;  %v3217_v7 = vld [vmem:[#allocation9 + $0x98] ss:$12 sps:$4 sm:$0xff]  }
 0x1a1   :  { %2986 = vmatpush3.bf16.msra.mxu1 %v3217_v7 }
 0x1a2   :  { %2987 = vmatprep.subr.bf16.mxu1 %v3466_v0 }
 0x1a5   :  { %2988 = vmatpush3.bf16.msra.mxu1 %v3218_v43 }
 0x1a6   :  { %2993 = vmatprep.subr.bf16.mxu1 %v3466_v0 }
 0x255   :  { %v856_v46 = vpop.f32.mrb[20].mxu0  ;;  %v897_v48 = vpop.f32.mrb[12].mxu1 }
 0x256   :  { %v909_v50 = vadd.f32 %v856_v46, %v3639_v63  ;;  %v858_v51 = vpop.f32.mrb[21].mxu0  ;;  %v2971_v58 = vpop.f32.mrb[13].mxu1  ;;  %v923_v28 = vadd.f32 %v3693_v56, %v897_v48 }
 0x257   :  { %v916_v59 = vadd.f32 %v858_v51, %v3641_v2  ;;  %v860_v61 = vpop.f32.mrb[22].mxu0  ;;  %v900_v54 = vpop.f32.mrb[14].mxu1 }
 0x258   :  { %v2635_v57 = vmul.f32 -1.442695, %v909_v50  ;;  %v861_v62 = vpop.f32.mrb[23].mxu0  ;;  %v2972_v4 = vpop.f32.mrb[15].mxu1 }
 0x259   :  { %v2636_v6 = vmul.f32 -1.442695, %v916_v59 }
 0x25a   :  { %3293 = vpow2.f32 %v2635_v57 }
 0x25b   :  { %3295 = vpow2.f32 %v2636_v6 }
 0x264   :  { %v3294_v9 = vpop.eup %3293 }
 0x265   :  { %v913_v14 = vadd.f32 1.0, %v3294_v9  ;;  %v3296_v20 = vpop.eup %3295 }
 0x266   :  { %v920_v29 = vadd.f32 1.0, %v3296_v20 }
 0x267   :  { %3297 = vrcp.f32 %v913_v14 }
 0x271   :  { %v3298_v3 = vpop.eup %3297 }
 0x272   :  { %v924_v63 = vmul.f32 %v3298_v3, %v923_v28  ;;  %v3780_v28 = vld [vmem:[#allocation9] ss:$12 sps:$4 sm:$0xff]   ;;  %v3230_v3 = vld [vmem:[#allocation9 + $0x8] ss:$12 sps:$4 sm:$0xff]  }
 0x274   :  { %v925_v13 = vadd.f32 %v924_v63, %v3650_v10  ;;  %v3784_v63 = vld [vmem:[#allocation9 + $0x1c] ss:$12 sps:$4 sm:$0xff]  }
 0x276   :  { %3299 = vtanh.f32 %v925_v13  ;;  %v3787_v13 = vld [vmem:[#allocation9 + $0x18] ss:$12 sps:$4 sm:$0xff]  }
 0x277   :  { %3301 = vrcp.f32 %v920_v29  ;;  %v3234_v29 = vld [vmem:[#allocation9 + $0x20] ss:$12 sps:$4 sm:$0xff]  }
 0x280   :  { %v3300_v2 = vpop.eup %3299 }
 0x281   :  { %v927_v35 = vsub.f32 %v3697_v24, %v3300_v2  ;;  %v3302_v39 = vpop.eup %3301 }
 0x283   :  { %v928_v42 = vmul.f32 %v3302_v39, %v927_v35  ;;  %v3794_v35 = vld [vmem:[#allocation9 + $0x30] ss:$12 sps:$4 sm:$0xff]   ;;  %v3238_v39 = vld [vmem:[#allocation9 + $0x38] ss:$12 sps:$4 sm:$0xff]  }
 0x285   :  { %v3734_v7 = vadd.f32 %v3300_v2, %v928_v42  ;;  %v3791_v2 = vld [vmem:[#allocation9 + $0x34] ss:$12 sps:$4 sm:$0xff]   ;;  %v3798_v42 = vld [vmem:[#allocation9 + $0x4c] ss:$12 sps:$4 sm:$0xff]  }
 0x287   :  { %931 = vst [vmem:[#allocation10 + $0x8] sm:$0xff] %v3734_v7  ;;  %v932_v43 = vpack.c.bf16 %v3734_v7, %v3734_v7 }
 0x289   :  { %1126 = vmatmul.mubr.bf16.vlgmr.msra.gmra.mrb[24].mxu0 %v932_v43  ;;  %2990 = vmatmul.mubr.bf16.vlgmr.msra.gmra.mrb[16].mxu1 %v932_v43  ;;  %v3242_v43 = vld [vmem:[#allocation9 + $0x50] ss:$12 sps:$4 sm:$0xff]  }
 0x28a   :  { %1365 = vmatpush1.bf16.msra.mxu0 %v3543_v11  ;;  %1396 = vmatprep.mubr.bf16.mxu0 %v3468_v40  ;;  %v3219_v11 = vld [vmem:[#allocation9 + $0x8] ss:$12 sps:$4 sm:$0xff]  }
 0x28b   :  { %1366 = vmatprep.subr.bf16.mxu0 %v3546_v12  ;;  %3009 = vmatprep.mubr.msk.bf16.mxu1 %vm3467_vm0, %v3466_v0  ;;  %v3220_v12 = vld [vmem:[#allocation9 + $0x20] ss:$12 sps:$4 sm:$0xff]  }
 0x28c   :  { %2994 = vmatpush3.bf16.msra.mxu1 %v3219_v11  ;;  %v3805_v11 = vld [vmem:[#allocation9 + $0x60] ss:$12 sps:$4 sm:$0xff]  }
 0x28d   :  { %2995 = vmatprep.subr.bf16.mxu1 %v3466_v0 }
 0x28e   :  { %1367 = vmatpush1.bf16.msra.mxu0 %v3550_v15  ;;  %v3221_v15 = vld [vmem:[#allocation9 + $0x38] ss:$12 sps:$4 sm:$0xff]  }
 0x28f   :  { %1368 = vmatprep.subr.bf16.mxu0 %v3553_v16  ;;  %v3222_v16 = vld [vmem:[#allocation9 + $0x50] ss:$12 sps:$4 sm:$0xff]  }
 0x290   :  { %2996 = vmatpush3.bf16.msra.mxu1 %v3220_v12  ;;  %v3807_v12 = vld [vmem:[#allocation9 + $0x64] ss:$12 sps:$4 sm:$0xff]  }
 0x291   :  { %2997 = vmatprep.subr.bf16.mxu1 %v3466_v0 }
 0x292   :  { %1369 = vmatpush1.bf16.msra.mxu0 %v3555_v18  ;;  %v3223_v18 = vld [vmem:[#allocation9 + $0x68] ss:$12 sps:$4 sm:$0xff]  }
 0x293   :  { %1370 = vmatprep.subr.bf16.mxu0 %v3557_v19  ;;  %v3224_v19 = vld [vmem:[#allocation9 + $0x80] ss:$12 sps:$4 sm:$0xff]  }
 0x294   :  { %2998 = vmatpush3.bf16.msra.mxu1 %v3221_v15  ;;  %v3246_v15 = vld [vmem:[#allocation9 + $0x68] ss:$12 sps:$4 sm:$0xff]  }
 0x295   :  { %2999 = vmatprep.subr.bf16.mxu1 %v3466_v0 }
 0x296   :  { %1371 = vmatpush1.bf16.msra.mxu0 %v3562_v22  ;;  %v3225_v22 = vld [vmem:[#allocation9 + $0x98] ss:$12 sps:$4 sm:$0xff]  }
 0x297   :  { %1372 = vmatprep.subr.bf16.mxu0 %v3565_v23  ;;  %v3226_v23 = vld [vmem:[#allocation9 + $0xb0] ss:$12 sps:$4 sm:$0xff]  }
 0x298   :  { %3000 = vmatpush3.bf16.msra.mxu1 %v3222_v16  ;;  %v3810_v16 = vld [vmem:[#allocation9 + $0x7c] ss:$12 sps:$4 sm:$0xff]  }
 0x299   :  { %3001 = vmatprep.subr.bf16.mxu1 %v3466_v0 }
 0x29a   :  { %1373 = vmatpush1.bf16.msra.mxu0 %v3570_v26 }
 0x29b   :  { %1374 = vmatprep.subr.bf16.mxu0 %v3572_v27 }
 0x29c   :  { %3002 = vmatpush3.bf16.msra.mxu1 %v3223_v18  ;;  %v3814_v18 = vld [vmem:[#allocation9 + $0x78] ss:$12 sps:$4 sm:$0xff]  }
 0x29d   :  { %3003 = vmatprep.subr.bf16.mxu1 %v3466_v0 }
 0x29e   :  { %1375 = vmatpush1.bf16.msra.mxu0 %v3578_v30 }
 0x29f   :  { %1376 = vmatprep.subr.bf16.mxu0 %v3580_v32 }
 0x2a0   :  { %3004 = vmatpush3.bf16.msra.mxu1 %v3224_v19  ;;  %v3250_v19 = vld [vmem:[#allocation9 + $0x80] ss:$12 sps:$4 sm:$0xff]  }
 0x2a1   :  { %3005 = vmatprep.subr.bf16.mxu1 %v3466_v0 }
 0x2a2   :  { %1377 = vmatpush1.bf16.msra.mxu0 %v3586_v34 }
 0x2a3   :  { %1378 = vmatprep.subr.bf16.mxu0 %v3588_v36 }
 0x2a4   :  { %3006 = vmatpush3.bf16.msra.mxu1 %v3225_v22  ;;  %v3818_v22 = vld [vmem:[#allocation9 + $0x94] ss:$12 sps:$4 sm:$0xff]  }
 0x2a5   :  { %3007 = vmatprep.subr.bf16.mxu1 %v3466_v0 }
 0x2a6   :  { %1379 = vmatpush1.bf16.msra.mxu0 %v3594_v38 }
 0x2a8   :  { %3008 = vmatpush3.bf16.msra.mxu1 %v3226_v23  ;;  %v3821_v23 = vld [vmem:[#allocation9 + $0x90] ss:$12 sps:$4 sm:$0xff]  }
 0x2a9   :  { %3013 = vmatprep.subr.bf16.mxu1 %v3466_v0 }
 0x35c   :  { %v1127_v26 = vpop.f32.mrb[24].mxu0  ;;  %v1168_v27 = vpop.f32.mrb[16].mxu1 }
 0x35d   :  { %v1180_v30 = vadd.f32 %v1127_v26, %v3645_v5  ;;  %v1129_v32 = vpop.f32.mrb[25].mxu0  ;;  %v2991_v34 = vpop.f32.mrb[17].mxu1  ;;  %v1194_v61 = vadd.f32 %v3693_v56, %v1168_v27  ;;  %v3254_v26 = vld [vmem:[#allocation9 + $0x98] ss:$12 sps:$4 sm:$0xff]  }
 0x35e   :  { %v1187_v36 = vadd.f32 %v1129_v32, %v3647_v8  ;;  %v1131_v38 = vpop.f32.mrb[26].mxu0  ;;  %v1171_v10 = vpop.f32.mrb[18].mxu1  ;;  %v3825_v27 = vld [vmem:[#allocation9 + $0xac] ss:$12 sps:$4 sm:$0xff]   ;;  %v3258_v32 = vld [vmem:[#allocation9 + $0xb0] ss:$12 sps:$4 sm:$0xff]  }
 0x35f   :  { %v2661_v24 = vmul.f32 -1.442695, %v1180_v30  ;;  %v1132_v46 = vpop.f32.mrb[27].mxu0  ;;  %v2992_v48 = vpop.f32.mrb[19].mxu1  ;;  %v3828_v30 = vld [vmem:[#allocation9 + $0xa8] ss:$12 sps:$4 sm:$0xff]  }
 0x360   :  { %v2662_v50 = vmul.f32 -1.442695, %v1187_v36 }
 0x361   :  { %3303 = vpow2.f32 %v2661_v24 }
 0x362   :  { %3305 = vpow2.f32 %v2662_v50 }
 0x36b   :  { %v3304_v51 = vpop.eup %3303 }
 0x36c   :  { %v1184_v58 = vadd.f32 1.0, %v3304_v51  ;;  %v3306_v59 = vpop.eup %3305 }
 0x36d   :  { %v1191_v62 = vadd.f32 1.0, %v3306_v59 }
 0x36e   :  { %3307 = vrcp.f32 %v1184_v58 }
 0x378   :  { %v3308_v54 = vpop.eup %3307 }
 0x379   :  { %v1195_v5 = vmul.f32 %v3308_v54, %v1194_v61 }
 0x37b   :  { %v1196_v57 = vadd.f32 %v1195_v5, %v3660_v31  ;;  %v3778_v31 = vld [vmem:[#allocation9 + $0x4] ss:$12 sps:$4 sm:$0xff]  }
 0x37c   :  { %1635 = vmatprep.subr.bf16.mxu0 %v3778_v31 }
 0x37d   :  { %3309 = vtanh.f32 %v1196_v57 }
 0x37e   :  { %3311 = vrcp.f32 %v1191_v62 }
 0x387   :  { %v3310_v8 = vpop.eup %3309 }
 0x388   :  { %v1198_v4 = vsub.f32 %v3734_v7, %v3310_v8  ;;  %v3312_v6 = vpop.eup %3311  ;;  %v3801_v7 = vld [vmem:[#allocation9 + $0x48] ss:$12 sps:$4 sm:$0xff]  }
 0x38a   :  { %v1199_v9 = vmul.f32 %v3312_v6, %v1198_v4 }
 0x38c   :  { %v3770_v14 = vadd.f32 %v3310_v8, %v1199_v9 }
 0x38e   :  { %1202 = vst [vmem:[#allocation10 + $0x10] sm:$0xff] %v3770_v14  ;;  %v1203_v20 = vpack.c.bf16 %v3770_v14, %v3770_v14 }
 0x390   :  { %1397 = vmatmul.mubr.bf16.vlgmr.msra.gmra.mrb[28].mxu0 %v1203_v20  ;;  %3010 = vmatmul.mubr.bf16.vlgmr.msra.gmra.mrb[20].mxu1 %v1203_v20 }
 0x391   :  { %1667 = vmatprep.mubr.bf16.mxu0 %v3468_v40  ;;  %3029 = vmatprep.mubr.msk.bf16.mxu1 %vm3467_vm0, %v3466_v0 }
 0x392   :  { %1636 = vmatpush1.bf16.msra.mxu0 %v3780_v28  ;;  %3014 = vmatpush3.bf16.msra.mxu1 %v3230_v3 }
 0x393   :  { %3015 = vmatprep.subr.bf16.mxu1 %v3466_v0  ;;  %1637 = vmatprep.subr.bf16.mxu0 %v3784_v63 }
 0x396   :  { %1638 = vmatpush1.bf16.msra.mxu0 %v3787_v13  ;;  %3016 = vmatpush3.bf16.msra.mxu1 %v3234_v29 }
 0x397   :  { %3017 = vmatprep.subr.bf16.mxu1 %v3466_v0  ;;  %1639 = vmatprep.subr.bf16.mxu0 %v3791_v2 }
 0x39a   :  { %1640 = vmatpush1.bf16.msra.mxu0 %v3794_v35  ;;  %3018 = vmatpush3.bf16.msra.mxu1 %v3238_v39 }
 0x39b   :  { %3019 = vmatprep.subr.bf16.mxu1 %v3466_v0  ;;  %1641 = vmatprep.subr.bf16.mxu0 %v3798_v42 }
 0x39e   :  { %1642 = vmatpush1.bf16.msra.mxu0 %v3801_v7  ;;  %3020 = vmatpush3.bf16.msra.mxu1 %v3242_v43  ;;  %v3261_v43 = vld [vmem:[#allocation9 + $0x38] ss:$12 sps:$4 sm:$0xff]  }
 0x39f   :  { %3021 = vmatprep.subr.bf16.mxu1 %v3466_v0  ;;  %1643 = vmatprep.subr.bf16.mxu0 %v3807_v12 }
 0x3a2   :  { %1644 = vmatpush1.bf16.msra.mxu0 %v3805_v11  ;;  %3022 = vmatpush3.bf16.msra.mxu1 %v3246_v15  ;;  %v3262_v15 = vld [vmem:[#allocation9 + $0x50] ss:$12 sps:$4 sm:$0xff]  }
 0x3a3   :  { %1645 = vmatprep.subr.bf16.mxu0 %v3810_v16  ;;  %3023 = vmatprep.subr.bf16.mxu1 %v3466_v0 }
 0x3a6   :  { %1646 = vmatpush1.bf16.msra.mxu0 %v3814_v18  ;;  %3024 = vmatpush3.bf16.msra.mxu1 %v3250_v19  ;;  %v3263_v19 = vld [vmem:[#allocation9 + $0x68] ss:$12 sps:$4 sm:$0xff]  }
 0x3a7   :  { %1647 = vmatprep.subr.bf16.mxu0 %v3818_v22  ;;  %3025 = vmatprep.subr.bf16.mxu1 %v3466_v0 }
 0x3aa   :  { %1648 = vmatpush1.bf16.msra.mxu0 %v3821_v23  ;;  %3026 = vmatpush3.bf16.msra.mxu1 %v3254_v26  ;;  %v3264_v26 = vld [vmem:[#allocation9 + $0x80] ss:$12 sps:$4 sm:$0xff]  }
 0x3ab   :  { %1649 = vmatprep.subr.bf16.mxu0 %v3825_v27  ;;  %3027 = vmatprep.subr.bf16.mxu1 %v3466_v0 }
 0x3ae   :  { %1650 = vmatpush1.bf16.msra.mxu0 %v3828_v30  ;;  %3028 = vmatpush3.bf16.msra.mxu1 %v3258_v32  ;;  %v3265_v32 = vld [vmem:[#allocation9 + $0x98] ss:$12 sps:$4 sm:$0xff]  }
 0x3af   :  { %1906 = vmatprep.subr.bf16.mxu0 %v3778_v31  ;;  %3033 = vmatprep.subr.bf16.mxu1 %v3466_v0 }
 0x463   :  { %v1398_v34 = vpop.f32.mrb[28].mxu0  ;;  %v1439_v36 = vpop.f32.mrb[20].mxu1 }
 0x464   :  { %v1451_v38 = vadd.f32 %v1398_v34, %v3652_v17  ;;  %v1400_v10 = vpop.f32.mrb[29].mxu0  ;;  %v3011_v24 = vpop.f32.mrb[21].mxu1  ;;  %v1465_v62 = vadd.f32 %v3693_v56, %v1439_v36  ;;  %v3266_v34 = vld [vmem:[#allocation9 + $0xb0] ss:$12 sps:$4 sm:$0xff]  }
 0x465   :  { %v1458_v46 = vadd.f32 %v1400_v10, %v3654_v21  ;;  %v1402_v48 = vpop.f32.mrb[30].mxu0  ;;  %v1442_v50 = vpop.f32.mrb[22].mxu1 }
 0x466   :  { %v2687_v51 = vmul.f32 -1.442695, %v1451_v38  ;;  %v1403_v58 = vpop.f32.mrb[31].mxu0  ;;  %v3012_v59 = vpop.f32.mrb[23].mxu1 }
 0x467   :  { %v2688_v61 = vmul.f32 -1.442695, %v1458_v46 }
 0x468   :  { %3313 = vpow2.f32 %v2687_v51 }
 0x469   :  { %3315 = vpow2.f32 %v2688_v61 }
 0x472   :  { %v3314_v54 = vpop.eup %3313 }
 0x473   :  { %v1455_v5 = vadd.f32 1.0, %v3314_v54  ;;  %v3316_v57 = vpop.eup %3315 }
 0x474   :  { %v1462_v6 = vadd.f32 1.0, %v3316_v57 }
 0x475   :  { %3317 = vrcp.f32 %v1455_v5 }
 0x47f   :  { %v3318_v8 = vpop.eup %3317 }
 0x480   :  { %v1466_v17 = vmul.f32 %v3318_v8, %v1465_v62 }
 0x482   :  { %v1467_v4 = vadd.f32 %v1466_v17, %v3657_v25  ;;  %v3259_v25 = vld [vmem:[#allocation9 + $0x8] ss:$12 sps:$4 sm:$0xff]  }
 0x484   :  { %3319 = vtanh.f32 %v1467_v4 }
 0x485   :  { %3321 = vrcp.f32 %v1462_v6 }
 0x48e   :  { %v3320_v21 = vpop.eup %3319 }
 0x48f   :  { %v1469_v9 = vsub.f32 %v3770_v14, %v3320_v21  ;;  %v3322_v20 = vpop.eup %3321  ;;  %v3260_v14 = vld [vmem:[#allocation9 + $0x20] ss:$12 sps:$4 sm:$0xff]  }
 0x491   :  { %v1470_v3 = vmul.f32 %v3322_v20, %v1469_v9 }
 0x493   :  { %v3840_v29 = vadd.f32 %v3320_v21, %v1470_v3 }
 0x495   :  { %1473 = vst [vmem:[#allocation10 + $0x18] sm:$0xff] %v3840_v29  ;;  %v1474_v39 = vpack.c.bf16 %v3840_v29, %v3840_v29 }
 0x497   :  { %1668 = vmatmul.mubr.bf16.vlgmr.msra.gmra.mrb[32].mxu0 %v1474_v39  ;;  %3030 = vmatmul.mubr.bf16.vlgmr.msra.gmra.mrb[24].mxu1 %v1474_v39 }
 0x498   :  { %1907 = vmatpush1.bf16.msra.mxu0 %v3780_v28  ;;  %1938 = vmatprep.mubr.bf16.mxu0 %v3468_v40 }
 0x499   :  { %1908 = vmatprep.subr.bf16.mxu0 %v3784_v63  ;;  %3049 = vmatprep.mubr.msk.bf16.mxu1 %vm3467_vm0, %v3466_v0 }
 0x49a   :  { %3034 = vmatpush3.bf16.msra.mxu1 %v3259_v25  ;;  %v3269_v25 = vld [vmem:[#allocation9 + $0x38] ss:$12 sps:$4 sm:$0xff]  }
 0x49b   :  { %3035 = vmatprep.subr.bf16.mxu1 %v3466_v0 }
 0x49c   :  { %1909 = vmatpush1.bf16.msra.mxu0 %v3787_v13 }
 0x49d   :  { %1910 = vmatprep.subr.bf16.mxu0 %v3791_v2 }
 0x49e   :  { %3036 = vmatpush3.bf16.msra.mxu1 %v3260_v14  ;;  %v3270_v14 = vld [vmem:[#allocation9 + $0x50] ss:$12 sps:$4 sm:$0xff]  }
 0x49f   :  { %3037 = vmatprep.subr.bf16.mxu1 %v3466_v0 }
 0x4a0   :  { %1911 = vmatpush1.bf16.msra.mxu0 %v3794_v35 }
 0x4a1   :  { %1912 = vmatprep.subr.bf16.mxu0 %v3798_v42 }
 0x4a2   :  { %3038 = vmatpush3.bf16.msra.mxu1 %v3261_v43  ;;  %v3271_v43 = vld [vmem:[#allocation9 + $0x68] ss:$12 sps:$4 sm:$0xff]  }
 0x4a3   :  { %3039 = vmatprep.subr.bf16.mxu1 %v3466_v0 }
 0x4a4   :  { %1913 = vmatpush1.bf16.msra.mxu0 %v3801_v7 }
 0x4a5   :  { %1914 = vmatprep.subr.bf16.mxu0 %v3807_v12 }
 0x4a6   :  { %3040 = vmatpush3.bf16.msra.mxu1 %v3262_v15  ;;  %v3272_v15 = vld [vmem:[#allocation9 + $0x80] ss:$12 sps:$4 sm:$0xff]  }
 0x4a7   :  { %3041 = vmatprep.subr.bf16.mxu1 %v3466_v0 }
 0x4a8   :  { %1915 = vmatpush1.bf16.msra.mxu0 %v3805_v11 }
 0x4a9   :  { %1916 = vmatprep.subr.bf16.mxu0 %v3810_v16 }
 0x4aa   :  { %3042 = vmatpush3.bf16.msra.mxu1 %v3263_v19  ;;  %v3274_v19 = vld [vmem:[#allocation9 + $0xb0] ss:$12 sps:$4 sm:$0xff]  }
 0x4ab   :  { %3043 = vmatprep.subr.bf16.mxu1 %v3466_v0 }
 0x4ac   :  { %1917 = vmatpush1.bf16.msra.mxu0 %v3814_v18 }
 0x4ad   :  { %1918 = vmatprep.subr.bf16.mxu0 %v3818_v22 }
 0x4ae   :  { %3044 = vmatpush3.bf16.msra.mxu1 %v3264_v26 }
 0x4af   :  { %3045 = vmatprep.subr.bf16.mxu1 %v3466_v0 }
 0x4b0   :  { %1919 = vmatpush1.bf16.msra.mxu0 %v3821_v23 }
 0x4b1   :  { %1920 = vmatprep.subr.bf16.mxu0 %v3825_v27 }
 0x4b2   :  { %3046 = vmatpush3.bf16.msra.mxu1 %v3265_v32 }
 0x4b3   :  { %3047 = vmatprep.subr.bf16.mxu1 %v3466_v0 }
 0x4b4   :  { %1921 = vmatpush1.bf16.msra.mxu0 %v3828_v30 }
 0x4b5   :  { %2177 = vmatprep.subr.bf16.mxu0 %v3778_v31 }
 0x4b6   :  { %3048 = vmatpush3.bf16.msra.mxu1 %v3266_v34 }
 0x4b7   :  { %3053 = vmatprep.subr.bf16.mxu1 %v3466_v0 }
 0x56a   :  { %v1669_v36 = vpop.f32.mrb[32].mxu0  ;;  %v1710_v38 = vpop.f32.mrb[24].mxu1 }
 0x56b   :  { %v1722_v10 = vadd.f32 %v1669_v36, %v3662_v33  ;;  %v1671_v24 = vpop.f32.mrb[33].mxu0  ;;  %v3031_v46 = vpop.f32.mrb[25].mxu1  ;;  %v1736_v8 = vadd.f32 %v3693_v56, %v1710_v38 }
 0x56c   :  { %v1729_v48 = vadd.f32 %v1671_v24, %v3664_v37  ;;  %v1673_v50 = vpop.f32.mrb[34].mxu0  ;;  %v1713_v51 = vpop.f32.mrb[26].mxu1 }
 0x56d   :  { %v2713_v58 = vmul.f32 -1.442695, %v1722_v10  ;;  %v1674_v59 = vpop.f32.mrb[35].mxu0  ;;  %v3032_v61 = vpop.f32.mrb[27].mxu1 }
 0x56e   :  { %v2714_v54 = vmul.f32 -1.442695, %v1729_v48 }
 0x56f   :  { %3323 = vpow2.f32 %v2713_v58 }
 0x570   :  { %3325 = vpow2.f32 %v2714_v54 }
 0x579   :  { %v3324_v5 = vpop.eup %3323 }
 0x57a   :  { %v1726_v57 = vadd.f32 1.0, %v3324_v5  ;;  %v3326_v62 = vpop.eup %3325 }
 0x57b   :  { %v1733_v6 = vadd.f32 1.0, %v3326_v62 }
 0x57c   :  { %3327 = vrcp.f32 %v1726_v57 }
 0x586   :  { %v3328_v17 = vpop.eup %3327 }
 0x587   :  { %v1737_v33 = vmul.f32 %v3328_v17, %v1736_v8 }
 0x589   :  { %v1738_v4 = vadd.f32 %v1737_v33, %v3670_v44  ;;  %v3267_v44 = vld [vmem:[#allocation9 + $0x8] ss:$12 sps:$4 sm:$0xff]  }
 0x58b   :  { %3329 = vtanh.f32 %v1738_v4 }
 0x58c   :  { %3331 = vrcp.f32 %v1733_v6 }
 0x595   :  { %v3330_v37 = vpop.eup %3329 }
 0x596   :  { %v1740_v21 = vsub.f32 %v3840_v29, %v3330_v37  ;;  %v3332_v9 = vpop.eup %3331  ;;  %v3268_v29 = vld [vmem:[#allocation9 + $0x20] ss:$12 sps:$4 sm:$0xff]  }
 0x598   :  { %v1741_v20 = vmul.f32 %v3332_v9, %v1740_v21 }
 0x59a   :  { %v3877_v3 = vadd.f32 %v3330_v37, %v1741_v20 }
 0x59c   :  { %1744 = vst [vmem:[#allocation10 + $0x20] sm:$0xff] %v3877_v3  ;;  %v1745_v39 = vpack.c.bf16 %v3877_v3, %v3877_v3 }
 0x59e   :  { %1939 = vmatmul.mubr.bf16.vlgmr.msra.gmra.mrb[36].mxu0 %v1745_v39  ;;  %3050 = vmatmul.mubr.bf16.vlgmr.msra.gmra.mrb[28].mxu1 %v1745_v39 }
 0x59f   :  { %2178 = vmatpush1.bf16.msra.mxu0 %v3780_v28  ;;  %2209 = vmatprep.mubr.bf16.mxu0 %v3468_v40 }
 0x5a0   :  { %2179 = vmatprep.subr.bf16.mxu0 %v3784_v63  ;;  %3069 = vmatprep.mubr.msk.bf16.mxu1 %vm3467_vm0, %v3466_v0 }
 0x5a1   :  { %3054 = vmatpush3.bf16.msra.mxu1 %v3267_v44 }
 0x5a2   :  { %3055 = vmatprep.subr.bf16.mxu1 %v3466_v0 }
 0x5a3   :  { %2180 = vmatpush1.bf16.msra.mxu0 %v3787_v13 }
 0x5a4   :  { %2181 = vmatprep.subr.bf16.mxu0 %v3791_v2 }
 0x5a5   :  { %3056 = vmatpush3.bf16.msra.mxu1 %v3268_v29 }
 0x5a6   :  { %3057 = vmatprep.subr.bf16.mxu1 %v3466_v0 }
 0x5a7   :  { %2182 = vmatpush1.bf16.msra.mxu0 %v3794_v35 }
 0x5a8   :  { %2183 = vmatprep.subr.bf16.mxu0 %v3798_v42 }
 0x5a9   :  { %3058 = vmatpush3.bf16.msra.mxu1 %v3269_v25 }
 0x5aa   :  { %3059 = vmatprep.subr.bf16.mxu1 %v3466_v0 }
 0x5ab   :  { %2184 = vmatpush1.bf16.msra.mxu0 %v3801_v7 }
 0x5ac   :  { %2185 = vmatprep.subr.bf16.mxu0 %v3807_v12 }
 0x5ad   :  { %3060 = vmatpush3.bf16.msra.mxu1 %v3270_v14 }
 0x5ae   :  { %3061 = vmatprep.subr.bf16.mxu1 %v3466_v0 }
 0x5af   :  { %2186 = vmatpush1.bf16.msra.mxu0 %v3805_v11 }
 0x5b0   :  { %2187 = vmatprep.subr.bf16.mxu0 %v3810_v16 }
 0x5b1   :  { %3062 = vmatpush3.bf16.msra.mxu1 %v3271_v43 }
 0x5b2   :  { %3063 = vmatprep.subr.bf16.mxu1 %v3466_v0 }
 0x5b3   :  { %2188 = vmatpush1.bf16.msra.mxu0 %v3814_v18 }
 0x5b4   :  { %2189 = vmatprep.subr.bf16.mxu0 %v3818_v22 }
 0x5b5   :  { %3064 = vmatpush3.bf16.msra.mxu1 %v3272_v15 }
 0x5b6   :  { %3065 = vmatprep.subr.bf16.mxu1 %v3466_v0 }
 0x5b7   :  { %2190 = vmatpush1.bf16.msra.mxu0 %v3821_v23 }
 0x5b8   :  { %2191 = vmatprep.subr.bf16.mxu0 %v3825_v27 }
 0x5bb   :  { %2192 = vmatpush1.bf16.msra.mxu0 %v3828_v30 }
 0x5bc   :  { %2448 = vmatprep.subr.bf16.mxu0 %v3778_v31  ;;  %v3273_v31 = vld [vmem:[#allocation9 + $0x98] ss:$12 sps:$4 sm:$0xff]  }
 0x5bd   :  { %3066 = vmatpush3.bf16.msra.mxu1 %v3273_v31 }
 0x5be   :  { %3067 = vmatprep.subr.bf16.mxu1 %v3466_v0 }
 0x5c1   :  { %3068 = vmatpush3.bf16.msra.mxu1 %v3274_v19 }
 0x5c2   :  { %3073 = vmatprep.subr.bf16.mxu1 %v3466_v0 }
 0x671   :  { %v1940_v26 = vpop.f32.mrb[36].mxu0  ;;  %v1981_v32 = vpop.f32.mrb[28].mxu1 }
 0x672   :  { %v1993_v34 = vadd.f32 %v1940_v26, %v3672_v45  ;;  %v1942_v36 = vpop.f32.mrb[37].mxu0  ;;  %v3051_v38 = vpop.f32.mrb[29].mxu1  ;;  %v2007_v5 = vadd.f32 %v3693_v56, %v1981_v32 }
 0x673   :  { %v2000_v10 = vadd.f32 %v1942_v36, %v3674_v47  ;;  %v1944_v24 = vpop.f32.mrb[38].mxu0  ;;  %v1984_v46 = vpop.f32.mrb[30].mxu1 }
 0x674   :  { %v2739_v48 = vmul.f32 -1.442695, %v1993_v34  ;;  %v1945_v50 = vpop.f32.mrb[39].mxu0  ;;  %v3052_v51 = vpop.f32.mrb[31].mxu1 }
 0x675   :  { %v2740_v58 = vmul.f32 -1.442695, %v2000_v10 }
 0x676   :  { %3333 = vpow2.f32 %v2739_v48 }
 0x677   :  { %3335 = vpow2.f32 %v2740_v58 }
 0x680   :  { %v3334_v59 = vpop.eup %3333 }
 0x681   :  { %v1997_v61 = vadd.f32 1.0, %v3334_v59  ;;  %v3336_v54 = vpop.eup %3335 }
 0x682   :  { %v2004_v8 = vadd.f32 1.0, %v3336_v54 }
 0x683   :  { %3337 = vrcp.f32 %v1997_v61 }
 0x68d   :  { %v3338_v57 = vpop.eup %3337 }
 0x68e   :  { %v2008_v45 = vmul.f32 %v3338_v57, %v2007_v5 }
 0x690   :  { %v2009_v62 = vadd.f32 %v2008_v45, %v3667_v41  ;;  %v3276_v41 = vld [vmem:[#allocation9 + $0x20] ss:$12 sps:$4 sm:$0xff]  }
 0x692   :  { %3339 = vtanh.f32 %v2009_v62 }
 0x693   :  { %3341 = vrcp.f32 %v2004_v8 }
 0x69c   :  { %v3340_v47 = vpop.eup %3339 }
 0x69d   :  { %v2011_v17 = vsub.f32 %v3877_v3, %v3340_v47  ;;  %v3342_v33 = vpop.eup %3341 }
 0x69f   :  { %v2012_v4 = vmul.f32 %v3342_v33, %v2011_v17 }
 0x6a1   :  { %v3914_v6 = vadd.f32 %v3340_v47, %v2012_v4 }
 0x6a3   :  { %2015 = vst [vmem:[#allocation10 + $0x28] sm:$0xff] %v3914_v6  ;;  %v2016_v37 = vpack.c.bf16 %v3914_v6, %v3914_v6 }
 0x6a5   :  { %2210 = vmatmul.mubr.bf16.vlgmr.msra.gmra.mrb[40].mxu0 %v2016_v37  ;;  %3070 = vmatmul.mubr.bf16.vlgmr.msra.gmra.mrb[32].mxu1 %v2016_v37 }
 0x6a6   :  { %2449 = vmatpush1.bf16.msra.mxu0 %v3780_v28  ;;  %2480 = vmatprep.mubr.bf16.mxu0 %v3468_v40  ;;  %v3275_v40 = vld [vmem:[#allocation9 + $0x8] ss:$12 sps:$4 sm:$0xff]   ;;  %v3277_v28 = vld [vmem:[#allocation9 + $0x38] ss:$12 sps:$4 sm:$0xff]  }
 0x6a7   :  { %2450 = vmatprep.subr.bf16.mxu0 %v3784_v63  ;;  %3089 = vmatprep.mubr.msk.bf16.mxu1 %vm3467_vm0, %v3466_v0  ;;  %v3278_v63 = vld [vmem:[#allocation9 + $0x50] ss:$12 sps:$4 sm:$0xff]  }
 0x6a8   :  { %3074 = vmatpush3.bf16.msra.mxu1 %v3275_v40 }
 0x6a9   :  { %3075 = vmatprep.subr.bf16.mxu1 %v3466_v0 }
 0x6aa   :  { %2451 = vmatpush1.bf16.msra.mxu0 %v3787_v13  ;;  %v3279_v13 = vld [vmem:[#allocation9 + $0x68] ss:$12 sps:$4 sm:$0xff]  }
 0x6ab   :  { %2452 = vmatprep.subr.bf16.mxu0 %v3791_v2  ;;  %v3280_v2 = vld [vmem:[#allocation9 + $0x80] ss:$12 sps:$4 sm:$0xff]  }
 0x6ac   :  { %3076 = vmatpush3.bf16.msra.mxu1 %v3276_v41 }
 0x6ad   :  { %3077 = vmatprep.subr.bf16.mxu1 %v3466_v0 }
 0x6ae   :  { %2453 = vmatpush1.bf16.msra.mxu0 %v3794_v35  ;;  %v3281_v35 = vld [vmem:[#allocation9 + $0x98] ss:$12 sps:$4 sm:$0xff]  }
 0x6af   :  { %2454 = vmatprep.subr.bf16.mxu0 %v3798_v42  ;;  %v3282_v42 = vld [vmem:[#allocation9 + $0xb0] ss:$12 sps:$4 sm:$0xff]  }
 0x6b0   :  { %3078 = vmatpush3.bf16.msra.mxu1 %v3277_v28 }
 0x6b1   :  { %3079 = vmatprep.subr.bf16.mxu1 %v3466_v0 }
 0x6b2   :  { %2455 = vmatpush1.bf16.msra.mxu0 %v3801_v7 }
 0x6b3   :  { %2456 = vmatprep.subr.bf16.mxu0 %v3807_v12 }
 0x6b4   :  { %3080 = vmatpush3.bf16.msra.mxu1 %v3278_v63 }
 0x6b5   :  { %3081 = vmatprep.subr.bf16.mxu1 %v3466_v0 }
 0x6b6   :  { %2457 = vmatpush1.bf16.msra.mxu0 %v3805_v11 }
 0x6b7   :  { %2458 = vmatprep.subr.bf16.mxu0 %v3810_v16 }
 0x6b8   :  { %3082 = vmatpush3.bf16.msra.mxu1 %v3279_v13 }
 0x6b9   :  { %3083 = vmatprep.subr.bf16.mxu1 %v3466_v0 }
 0x6ba   :  { %2459 = vmatpush1.bf16.msra.mxu0 %v3814_v18 }
 0x6bb   :  { %2460 = vmatprep.subr.bf16.mxu0 %v3818_v22 }
 0x6bc   :  { %3084 = vmatpush3.bf16.msra.mxu1 %v3280_v2 }
 0x6bd   :  { %3085 = vmatprep.subr.bf16.mxu1 %v3466_v0 }
 0x6be   :  { %2461 = vmatpush1.bf16.msra.mxu0 %v3821_v23 }
 0x6bf   :  { %2462 = vmatprep.subr.bf16.mxu0 %v3825_v27 }
 0x6c0   :  { %3086 = vmatpush3.bf16.msra.mxu1 %v3281_v35 }
 0x6c1   :  { %3087 = vmatprep.subr.bf16.mxu1 %v3466_v0 }
 0x6c2   :  { %2463 = vmatpush1.bf16.msra.mxu0 %v3828_v30 }
 0x6c4   :  { %3088 = vmatpush3.bf16.msra.mxu1 %v3282_v42 }
 0x778   :  { %v2211_v7 = vpop.f32.mrb[40].mxu0  ;;  %v2252_v11 = vpop.f32.mrb[32].mxu1 }
 0x779   :  { %v2264_v12 = vadd.f32 %v2211_v7, %v3682_v53  ;;  %v2213_v16 = vpop.f32.mrb[41].mxu0  ;;  %v3071_v18 = vpop.f32.mrb[33].mxu1  ;;  %v2278_v44 = vadd.f32 %v3693_v56, %v2252_v11 }
 0x77a   :  { %v2271_v22 = vadd.f32 %v2213_v16, %v3684_v55  ;;  %v2215_v23 = vpop.f32.mrb[42].mxu0  ;;  %v2255_v27 = vpop.f32.mrb[34].mxu1 }
 0x77b   :  { %v2765_v30 = vmul.f32 -1.442695, %v2264_v12  ;;  %v2216_v21 = vpop.f32.mrb[43].mxu0  ;;  %v3072_v9 = vpop.f32.mrb[35].mxu1 }
 0x77c   :  { %v2766_v20 = vmul.f32 -1.442695, %v2271_v22 }
 0x77d   :  { %3343 = vpow2.f32 %v2765_v30 }
 0x77e   :  { %3345 = vpow2.f32 %v2766_v20 }
 0x787   :  { %v3344_v3 = vpop.eup %3343 }
 0x788   :  { %v2268_v39 = vadd.f32 1.0, %v3344_v3  ;;  %v3346_v0 = vpop.eup %3345 }
 0x789   :  { %v2275_v14 = vadd.f32 1.0, %v3346_v0 }
 0x78a   :  { %3347 = vrcp.f32 %v2268_v39 }
 0x794   :  { %v3348_v29 = vpop.eup %3347 }
 0x795   :  { %v2279_v53 = vmul.f32 %v3348_v29, %v2278_v44 }
 0x797   :  { %v2280_v25 = vadd.f32 %v2279_v53, %v3680_v52 }
 0x799   :  { %3349 = vtanh.f32 %v2280_v25 }
 0x79a   :  { %3351 = vrcp.f32 %v2275_v14 }
 0x7a3   :  { %v3350_v55 = vpop.eup %3349 }
 0x7a4   :  { %v2282_v43 = vsub.f32 %v3914_v6, %v3350_v55  ;;  %v3352_v15 = vpop.eup %3351 }
 0x7a6   :  { %v2283_v31 = vmul.f32 %v3352_v15, %v2282_v43 }
 0x7a8   :  { %v2284_v19 = vadd.f32 %v3350_v55, %v2283_v31 }
 0x7aa   :  { %2286 = vst [vmem:[#allocation10 + $0x30] sm:$0xff] %v2284_v19  ;;  %v2287_v26 = vpack.c.bf16 %v2284_v19, %v2284_v19 }
 0x7ac   :  { %2481 = vmatmul.mubr.bf16.vlgmr.msra.gmra.mrb[44].mxu0 %v2287_v26  ;;  %3090 = vmatmul.mubr.bf16.vlgmr.msra.gmra.mrb[36].mxu1 %v2287_v26 }
 0x87f   :  { %v2482_v32 = vpop.f32.mrb[44].mxu0  ;;  %v2523_v34 = vpop.f32.mrb[36].mxu1 }
 0x880   :  { %v2535_v36 = vadd.f32 %v2482_v32, %v3686_v60  ;;  %v2484_v38 = vpop.f32.mrb[45].mxu0  ;;  %v3091_v10 = vpop.f32.mrb[37].mxu1  ;;  %v2549_v5 = vadd.f32 %v3693_v56, %v2523_v34 }
 0x881   :  { %v2542_v52 = vadd.f32 %v2484_v38, %v3688_v1  ;;  %v2486_v24 = vpop.f32.mrb[46].mxu0  ;;  %v2526_v46 = vpop.f32.mrb[38].mxu1 }
 0x882   :  { %v2791_v48 = vmul.f32 -1.442695, %v2535_v36  ;;  %v2487_v50 = vpop.f32.mrb[47].mxu0  ;;  %v3092_v51 = vpop.f32.mrb[39].mxu1 }
 0x883   :  { %v2792_v58 = vmul.f32 -1.442695, %v2542_v52 }
 0x884   :  { %3353 = vpow2.f32 %v2791_v48 }
 0x885   :  { %3355 = vpow2.f32 %v2792_v58 }
 0x88e   :  { %v3354_v59 = vpop.eup %3353 }
 0x88f   :  { %v2539_v61 = vadd.f32 1.0, %v3354_v59  ;;  %v3356_v54 = vpop.eup %3355 }
 0x890   :  { %v2546_v62 = vadd.f32 1.0, %v3356_v54 }
 0x891   :  { %3357 = vrcp.f32 %v2539_v61 }
 0x89b   :  { %v3358_v57 = vpop.eup %3357 }
 0x89c   :  { %v2550_v60 = vmul.f32 %v3358_v57, %v2549_v5 }
 0x89e   :  { %v2551_v45 = vadd.f32 %v2550_v60, %v3677_v49 }
 0x8a0   :  { %3359 = vtanh.f32 %v2551_v45 }
 0x8a1   :  { %3361 = vrcp.f32 %v2546_v62 }
 0x8aa   :  { %v3360_v1 = vpop.eup %3359 }
 0x8ab   :  { %v2553_v8 = vsub.f32 %v2284_v19, %v3360_v1  ;;  %v3362_v47 = vpop.eup %3361 }
 0x8ad   :  { %v2554_v17 = vmul.f32 %v3362_v47, %v2553_v8 }
 0x8af   :  { %v2555_v33 = vadd.f32 %v3360_v1, %v2554_v17 }
 0x8b1   :  { %2557 = vst [vmem:[#allocation10 + $0x38] sm:$0xff] %v2555_v33 }
 0x8b2   :  { %3440 = shalt.err (!%p3437_p0)
}
 0x8b3   :  { %s3441_s14 = scalar_lea.hbm %s3973_s5, 1024 }
 0x8b4   :  { %p3442_p1 = scmp.ne.s32.totalorder %s3973_s5, %s3441_s14  ;;  %p3445_p2 = scmp.lt.u32.totalorder %s3441_s14, %s3973_s5 }
 0x8b6   :  { %p3447_p3 = pnand %p3445_p2, %p3442_p1 }
 0x8b8   :  { %3450 = shalt.err (!%p3447_p3)
}
 0x8b9   :  { %2570 = dma.vmem_to_hbm [thread:$0]  %s2565_s10, 1024, %s3973_s5, [#allocation6], %s3461_s1, %s3461_s1, %s3462_s17  }
 0x8ba   :  { %3455 = dma.done.wait [#allocation6], 1024  }
 0x8bb   :  { %3456 = vsyncadd [#allocation6], 4294966272 }
 0x8bc   :  { %2574 = vsyncpa [#allocation5], 1 }
 0x8bd   :  { %2575 = vsyncpa [#allocation8], 1 }
 0x8be   :  { %2576 = vsyncpa [#allocation6], 1 }

</bundles_post_ra>
